<compile_context>
chip_gen: v5e
topology: v5e:2x2
jax: 0.10.0
libtpu: 0.0.40
codegen_flags: <defaults>
</compile_context>

<pallas_src>
import functools

import jax
import jax.numpy as jnp
from jax.experimental import pallas as pl
from jax.experimental.pallas import tpu as pltpu


# ---------------------------------------------------------------------------
# The single fused Pallas kernel (one grid step = one batch element)
# ---------------------------------------------------------------------------
def _decoder_kernel(x_ref,
                    cb1_ref, sh1_ref, cbias1_ref,
                    g1_ref, p1_ref, ubias1_ref,
                    cb2_ref, sh2_ref, cbias2_ref,
                    g2_ref, p2_ref, ubias2_ref,
                    g3_ref, p3_ref, ubias3_ref,
                    rh_ref, rwt_ref,
                    o_ref):
    f32 = jnp.float32
    bf16 = jnp.bfloat16

    def mm(a, b):
        return jnp.dot(a, b, preferred_element_type=f32)

    def conv3x3_bn_relu(act, cb_ref, sh_ref, bias_ref):
        # act: (H, W*Cin) bf16  ->  (H, W*Cout) f32
        t_m1 = mm(act, cb_ref[0])                 # vertical tap dh = -1
        t_0 = mm(act, cb_ref[1])                  # dh = 0
        t_p1 = mm(act, cb_ref[2])                 # dh = +1
        y = t_0 + mm(sh_ref[0], t_m1) + mm(sh_ref[1], t_p1)
        return jnp.maximum(y + bias_ref[...], 0.0)

    def upconv2x2(act, g_ref, p_ref, bias_ref):
        # act: (H, W*Cin) bf16  ->  (2H, 2W*Cout) f32
        z0 = mm(act, g_ref[0])                    # output rows with parity 0
        z1 = mm(act, g_ref[1])                    # output rows with parity 1
        return mm(p_ref[0], z0) + mm(p_ref[1], z1) + bias_ref[...]

    x = x_ref[0]                                                        # (S, S*C4) bf16
    h1 = conv3x3_bn_relu(x, cb1_ref, sh1_ref, cbias1_ref)               # (S, S*C2)
    u1 = upconv2x2(h1.astype(bf16), g1_ref, p1_ref, ubias1_ref)         # (2S, 2S*C2)
    h2 = conv3x3_bn_relu(u1.astype(bf16), cb2_ref, sh2_ref, cbias2_ref)  # (2S, 2S*C1)
    u2 = upconv2x2(h2.astype(bf16), g2_ref, p2_ref, ubias2_ref)         # (4S, 4S*C1)
    d = upconv2x2(u2.astype(bf16), g3_ref, p3_ref, ubias3_ref)          # (8S, 8S), 1x1 folded
    e = mm(rh_ref[...], mm(d, rwt_ref[...]))                            # (T, T) bilinear
    o_ref[0] = jax.nn.sigmoid(e).astype(o_ref.dtype)


# ---------------------------------------------------------------------------
# Parameter-derived tables (built once, outside the per-call path)
# ---------------------------------------------------------------------------
def _bilinear_matrix(out_size, in_size):
    # Matches torch F.interpolate(mode='bilinear', align_corners=False)
    scale = in_size / out_size
    i = jnp.arange(out_size, dtype=jnp.float32)
    src = jnp.maximum((i + 0.5) * scale - 0.5, 0.0)
    i0 = jnp.minimum(jnp.floor(src), in_size - 1)
    frac = src - i0
    i0 = i0.astype(jnp.int32)
    i1 = jnp.minimum(i0 + 1, in_size - 1)
    m = jnp.zeros((out_size, in_size), jnp.float32)
    m = m.at[jnp.arange(out_size), i0].add(1.0 - frac)
    m = m.at[jnp.arange(out_size), i1].add(frac)
    return m


def precompute_decoder_tables(params, spatial, input_size, eps=1e-5):
    f32, bf16 = jnp.float32, jnp.bfloat16
    S = spatial

    def fold_bn(w, b, gamma, beta, mean, var):
        scale = gamma / jnp.sqrt(var + eps)
        return w * scale[:, None, None, None], (b - mean) * scale + beta

    def conv3x3_tables(w_oihw, b_vec, W):
        cout, cin = w_oihw.shape[0], w_oihw.shape[1]
        bands = []
        for dh in (-1, 0, 1):
            B = jnp.zeros((W * cin, W * cout), f32)
            for dw in (-1, 0, 1):
                blk = jnp.transpose(w_oihw[:, :, dh + 1, dw + 1])    # (Cin, Cout)
                B = B + jnp.kron(jnp.eye(W, k=-dw, dtype=f32), blk)
            bands.append(B)
        bands = jnp.stack(bands, 0).astype(bf16)                      # (3, W*Cin, W*Cout)
        shifts = jnp.stack([jnp.eye(W, k=-1, dtype=f32),
                            jnp.eye(W, k=1, dtype=f32)], 0)           # (2, H, H)
        bias = jnp.tile(b_vec, (W,)).reshape(1, W * cout).astype(f32)
        return bands, shifts, bias

    def upconv_tables(w_iokk, b_vec, W):
        cin, cout = w_iokk.shape[0], w_iokk.shape[1]
        idx = jnp.arange(W)
        gmats, pmats = [], []
        for a in (0, 1):
            G = jnp.zeros((W * cin, 2 * W * cout), f32)
            for b in (0, 1):
                E = jnp.zeros((W, 2 * W), f32).at[idx, 2 * idx + b].set(1.0)
                G = G + jnp.kron(E, w_iokk[:, :, a, b].astype(f32))
            gmats.append(G)
            P = jnp.zeros((2 * W, W), f32).at[2 * idx + a, idx].set(1.0)
            pmats.append(P)
        G = jnp.stack(gmats, 0).astype(bf16)                          # (2, W*Cin, 2W*Cout)
        P = jnp.stack(pmats, 0)                                       # (2, 2W, W) f32
        bias = jnp.tile(b_vec, (2 * W,)).reshape(1, 2 * W * cout).astype(f32)
        return G, P, bias

    # conv1 + BN1 (eval mode, folded)
    w1, b1 = fold_bn(params["conv1_w"], params["conv1_b"], params["bn1_gamma"],
                     params["bn1_beta"], params["bn1_mean"], params["bn1_var"])
    cb1, sh1, cbias1 = conv3x3_tables(w1, b1, S)

    # upconvtrans1
    g1, p1, ubias1 = upconv_tables(params["up1_w"], params["up1_b"], S)

    # conv2 + BN2
    w2, b2 = fold_bn(params["conv2_w"], params["conv2_b"], params["bn2_gamma"],
                     params["bn2_beta"], params["bn2_mean"], params["bn2_var"])
    cb2, sh2, cbias2 = conv3x3_tables(w2, b2, 2 * S)

    # upconvtrans2
    g2, p2, ubias2 = upconv_tables(params["up2_w"], params["up2_b"], 2 * S)

    # final_upconvtrans with the 1x1 final_conv folded in (Cout = 1)
    fc = params["fc_w"][0, :, 0, 0]                                   # (C1,)
    w3f = jnp.einsum("ioab,o->iab", params["up3_w"], fc)[:, None, :, :]
    b3f = jnp.sum(params["up3_b"] * fc) + params["fc_b"][0]
    g3, p3, ubias3 = upconv_tables(w3f, b3f.reshape(1), 4 * S)

    # bilinear interpolation matrices (separable)
    rh = _bilinear_matrix(input_size, 8 * S)                          # (T, 8S)
    rwt = jnp.transpose(_bilinear_matrix(input_size, 8 * S))          # (8S, T)

    return (cb1, sh1, cbias1, g1, p1, ubias1,
            cb2, sh2, cbias2, g2, p2, ubias2,
            g3, p3, ubias3, rh, rwt)


# ---------------------------------------------------------------------------
# Forward pass (single pallas_call)
# ---------------------------------------------------------------------------
def decoder_forward(tables, x_nchw, input_size):
    N, C4, S, _ = x_nchw.shape
    T = input_size

    # NCHW -> wide layout (N, H, W*C); bf16 operands feed the MXU.
    xw = jnp.transpose(x_nchw, (0, 2, 3, 1)).reshape(N, S, S * C4)
    xw = xw.astype(jnp.bfloat16)

    def const_map(nd):
        return lambda n: (0,) * nd

    in_specs = [pl.BlockSpec((1, S, S * C4), lambda n: (n, 0, 0))]
    in_specs += [pl.BlockSpec(t.shape, const_map(t.ndim)) for t in tables]

    out = pl.pallas_call(
        _decoder_kernel,
        out_shape=jax.ShapeDtypeStruct((N, T, T), jnp.float32),
        grid=(N,),
        in_specs=in_specs,
        out_specs=pl.BlockSpec((1, T, T), lambda n: (n, 0, 0)),
        compiler_params=pltpu.CompilerParams(
            dimension_semantics=("parallel",)),
    )(xw, *tables)
    return out[:, None, :, :]                                         # NCHW


# ---------------------------------------------------------------------------
# Parameters and a pure-JAX reference (for validation)
# ---------------------------------------------------------------------------
def init_decoder_params(key, init_ch=4):
    c4, c2, c1 = init_ch * 4, init_ch * 2, init_ch
    ks = jax.random.split(key, 20)

    def nrm(k, shape, s=0.25):
        return jax.random.normal(k, shape, jnp.float32) * s

    return {
        "conv1_w": nrm(ks[0], (c2, c4, 3, 3)), "conv1_b": nrm(ks[1], (c2,)),
        "bn1_gamma": 1.0 + nrm(ks[2], (c2,)), "bn1_beta": nrm(ks[3], (c2,)),
        "bn1_mean": nrm(ks[4], (c2,)), "bn1_var": 1.0 + jnp.abs(nrm(ks[5], (c2,))),
        "up1_w": nrm(ks[6], (c2, c2, 2, 2)), "up1_b": nrm(ks[7], (c2,)),
        "conv2_w": nrm(ks[8], (c1, c2, 3, 3)), "conv2_b": nrm(ks[9], (c1,)),
        "bn2_gamma": 1.0 + nrm(ks[10], (c1,)), "bn2_beta": nrm(ks[11], (c1,)),
        "bn2_mean": nrm(ks[12], (c1,)), "bn2_var": 1.0 + jnp.abs(nrm(ks[13], (c1,))),
        "up2_w": nrm(ks[14], (c1, c1, 2, 2)), "up2_b": nrm(ks[15], (c1,)),
        "up3_w": nrm(ks[16], (c1, c1, 2, 2)), "up3_b": nrm(ks[17], (c1,)),
        "fc_w": nrm(ks[18], (1, c1, 1, 1)), "fc_b": nrm(ks[19], (1,)),
    }


def reference_forward(params, x_nchw, input_size, eps=1e-5):
    x = jnp.transpose(x_nchw, (0, 2, 3, 1))                           # NHWC

    def conv_bn_relu(h, w, b, gamma, beta, mean, var):
        y = jax.lax.conv_general_dilated(
            h, jnp.transpose(w, (2, 3, 1, 0)), (1, 1), ((1, 1), (1, 1)),
            dimension_numbers=("NHWC", "HWIO", "NHWC")) + b
        y = (y - mean) / jnp.sqrt(var + eps) * gamma + beta
        return jnp.maximum(y, 0.0)

    def conv_transpose2x2(h, w, b):
        n, hh, ww, _ = h.shape
        co = w.shape[1]
        y = jnp.einsum("nhwi,ioab->nhawbo", h, w).reshape(n, 2 * hh, 2 * ww, co)
        return y + b

    h = conv_bn_relu(x, params["conv1_w"], params["conv1_b"], params["bn1_gamma"],
                     params["bn1_beta"], params["bn1_mean"], params["bn1_var"])
    h = conv_transpose2x2(h, params["up1_w"], params["up1_b"])
    h = conv_bn_relu(h, params["conv2_w"], params["conv2_b"], params["bn2_gamma"],
                     params["bn2_beta"], params["bn2_mean"], params["bn2_var"])
    h = conv_transpose2x2(h, params["up2_w"], params["up2_b"])
    h = conv_transpose2x2(h, params["up3_w"], params["up3_b"])
    d = jnp.einsum("nhwc,c->nhw", h, params["fc_w"][0, :, 0, 0]) + params["fc_b"][0]
    rh = _bilinear_matrix(input_size, d.shape[1])
    rw = _bilinear_matrix(input_size, d.shape[2])
    e = jnp.einsum("ty,nyx,ux->ntu", rh, d, rw)
    return jax.nn.sigmoid(e)[:, None, :, :]


if __name__ == "__main__":
    key = jax.random.PRNGKey(0)
    k_param, k_x = jax.random.split(key)

    init_ch = 4          # small stand-in for the module's init_ch=16
    input_size = 16      # small stand-in for the module's input_size=48
    batch, spatial = 2, 8

    params = init_decoder_params(k_param, init_ch=init_ch)
    x = jax.random.normal(k_x, (batch, init_ch * 4, spatial, spatial), jnp.float32)

    # Parameter-derived matrices are built once, outside the per-call path.
    tables = jax.tree_util.tree_map(
        jax.block_until_ready,
        precompute_decoder_tables(params, spatial, input_size))

    fwd = jax.jit(functools.partial(decoder_forward, input_size=input_size))
    out = jax.block_until_ready(fwd(tables, x))

    assert out.shape == (batch, 1, input_size, input_size)
    assert bool(jnp.all(jnp.isfinite(out)))
    assert bool(jnp.all((out >= 0.0) & (out <= 1.0)))                 # sigmoid range

    # Validate against an independent pure-JAX (f32) reference.
    ref = reference_forward(params, x, input_size)
    err = float(jnp.max(jnp.abs(out - ref)))
    assert err < 3e-2, f"kernel vs reference max|err| = {err}"
    print("KERNEL_OK")
</pallas_src>

<mosaic_0001>
module attributes {stable_mosaic.version = 11 : i64} {
  func.func @_decoder_kernel(%arg0: i32, %arg1: memref<1x8x128xbf16, #tpu.memory_space<vmem>>, %arg2: memref<3x128x64xbf16, #tpu.memory_space<vmem>>, %arg3: memref<2x8x8xf32, #tpu.memory_space<vmem>>, %arg4: memref<1x64xf32, #tpu.memory_space<vmem>>, %arg5: memref<2x64x128xbf16, #tpu.memory_space<vmem>>, %arg6: memref<2x16x8xf32, #tpu.memory_space<vmem>>, %arg7: memref<1x128xf32, #tpu.memory_space<vmem>>, %arg8: memref<3x128x64xbf16, #tpu.memory_space<vmem>>, %arg9: memref<2x16x16xf32, #tpu.memory_space<vmem>>, %arg10: memref<1x64xf32, #tpu.memory_space<vmem>>, %arg11: memref<2x64x128xbf16, #tpu.memory_space<vmem>>, %arg12: memref<2x32x16xf32, #tpu.memory_space<vmem>>, %arg13: memref<1x128xf32, #tpu.memory_space<vmem>>, %arg14: memref<2x128x64xbf16, #tpu.memory_space<vmem>>, %arg15: memref<2x64x32xf32, #tpu.memory_space<vmem>>, %arg16: memref<1x64xf32, #tpu.memory_space<vmem>>, %arg17: memref<16x64xf32, #tpu.memory_space<vmem>>, %arg18: memref<64x16xf32, #tpu.memory_space<vmem>>, %arg19: memref<1x16x16xf32, #tpu.memory_space<vmem>>) attributes {dimension_semantics = [#tpu.dimension_semantics<parallel>], iteration_bounds = array<i64: 2>, scalar_prefetch = 0 : i64, scratch_operands = 0 : i64, tpu.core_type = #tpu.core_type<tc>, window_params = [{transform_indices = @transform_0, window_bounds = array<i64: 1, 8, 128>}, {pipeline_mode = #tpu.pipeline_mode<synchronous>, transform_indices = @transform_1, window_bounds = array<i64: 3, 128, 64>}, {pipeline_mode = #tpu.pipeline_mode<synchronous>, transform_indices = @transform_2, window_bounds = array<i64: 2, 8, 8>}, {pipeline_mode = #tpu.pipeline_mode<synchronous>, transform_indices = @transform_3, window_bounds = array<i64: 1, 64>}, {pipeline_mode = #tpu.pipeline_mode<synchronous>, transform_indices = @transform_4, window_bounds = array<i64: 2, 64, 128>}, {pipeline_mode = #tpu.pipeline_mode<synchronous>, transform_indices = @transform_5, window_bounds = array<i64: 2, 16, 8>}, {pipeline_mode = #tpu.pipeline_mode<synchronous>, transform_indices = @transform_6, window_bounds = array<i64: 1, 128>}, {pipeline_mode = #tpu.pipeline_mode<synchronous>, transform_indices = @transform_7, window_bounds = array<i64: 3, 128, 64>}, {pipeline_mode = #tpu.pipeline_mode<synchronous>, transform_indices = @transform_8, window_bounds = array<i64: 2, 16, 16>}, {pipeline_mode = #tpu.pipeline_mode<synchronous>, transform_indices = @transform_9, window_bounds = array<i64: 1, 64>}, {pipeline_mode = #tpu.pipeline_mode<synchronous>, transform_indices = @transform_10, window_bounds = array<i64: 2, 64, 128>}, {pipeline_mode = #tpu.pipeline_mode<synchronous>, transform_indices = @transform_11, window_bounds = array<i64: 2, 32, 16>}, {pipeline_mode = #tpu.pipeline_mode<synchronous>, transform_indices = @transform_12, window_bounds = array<i64: 1, 128>}, {pipeline_mode = #tpu.pipeline_mode<synchronous>, transform_indices = @transform_13, window_bounds = array<i64: 2, 128, 64>}, {pipeline_mode = #tpu.pipeline_mode<synchronous>, transform_indices = @transform_14, window_bounds = array<i64: 2, 64, 32>}, {pipeline_mode = #tpu.pipeline_mode<synchronous>, transform_indices = @transform_15, window_bounds = array<i64: 1, 64>}, {pipeline_mode = #tpu.pipeline_mode<synchronous>, transform_indices = @transform_16, window_bounds = array<i64: 16, 64>}, {pipeline_mode = #tpu.pipeline_mode<synchronous>, transform_indices = @transform_17, window_bounds = array<i64: 64, 16>}, {transform_indices = @transform_18, window_bounds = array<i64: 1, 16, 16>}]} {
    %c0 = arith.constant 0 : index
    %c0_0 = arith.constant 0 : index
    %c0_1 = arith.constant 0 : index
    %0 = vector.load %arg1[%c0, %c0_0, %c0_1] : memref<1x8x128xbf16, #tpu.memory_space<vmem>>, vector<1x8x128xbf16>
    %1 = vector.shape_cast %0 : vector<1x8x128xbf16> to vector<8x128xbf16>
    %c0_2 = arith.constant 0 : index
    %c0_3 = arith.constant 0 : index
    %c0_4 = arith.constant 0 : index
    %2 = vector.load %arg2[%c0_2, %c0_3, %c0_4] : memref<3x128x64xbf16, #tpu.memory_space<vmem>>, vector<1x128x64xbf16>
    %3 = vector.shape_cast %2 : vector<1x128x64xbf16> to vector<128x64xbf16>
    %cst = arith.constant dense<0.000000e+00> : vector<8x64xf32>
    %4 = tpu.matmul %1, %3, %cst {dimension_numbers = #tpu.dot_dimension_numbers<[1], [0], [0], [1], [0, 0, 1, 1], [], []>} : vector<8x128xbf16>, vector<128x64xbf16>, vector<8x64xf32> -> vector<8x64xf32>
    %c1 = arith.constant 1 : index
    %c0_5 = arith.constant 0 : index
    %c0_6 = arith.constant 0 : index
    %5 = vector.load %arg2[%c1, %c0_5, %c0_6] : memref<3x128x64xbf16, #tpu.memory_space<vmem>>, vector<1x128x64xbf16>
    %6 = vector.shape_cast %5 : vector<1x128x64xbf16> to vector<128x64xbf16>
    %cst_7 = arith.constant dense<0.000000e+00> : vector<8x64xf32>
    %7 = tpu.matmul %1, %6, %cst_7 {dimension_numbers = #tpu.dot_dimension_numbers<[1], [0], [0], [1], [0, 0, 1, 1], [], []>} : vector<8x128xbf16>, vector<128x64xbf16>, vector<8x64xf32> -> vector<8x64xf32>
    %c2 = arith.constant 2 : index
    %c0_8 = arith.constant 0 : index
    %c0_9 = arith.constant 0 : index
    %8 = vector.load %arg2[%c2, %c0_8, %c0_9] : memref<3x128x64xbf16, #tpu.memory_space<vmem>>, vector<1x128x64xbf16>
    %9 = vector.shape_cast %8 : vector<1x128x64xbf16> to vector<128x64xbf16>
    %cst_10 = arith.constant dense<0.000000e+00> : vector<8x64xf32>
    %10 = tpu.matmul %1, %9, %cst_10 {dimension_numbers = #tpu.dot_dimension_numbers<[1], [0], [0], [1], [0, 0, 1, 1], [], []>} : vector<8x128xbf16>, vector<128x64xbf16>, vector<8x64xf32> -> vector<8x64xf32>
    %c0_11 = arith.constant 0 : index
    %c0_12 = arith.constant 0 : index
    %c0_13 = arith.constant 0 : index
    %11 = vector.load %arg3[%c0_11, %c0_12, %c0_13] : memref<2x8x8xf32, #tpu.memory_space<vmem>>, vector<1x8x8xf32>
    %12 = vector.shape_cast %11 : vector<1x8x8xf32> to vector<8x8xf32>
    %cst_14 = arith.constant dense<0.000000e+00> : vector<8x64xf32>
    %13 = tpu.matmul %12, %4, %cst_14 {dimension_numbers = #tpu.dot_dimension_numbers<[1], [0], [0], [1], [0, 0, 1, 1], [], []>} : vector<8x8xf32>, vector<8x64xf32>, vector<8x64xf32> -> vector<8x64xf32>
    %14 = arith.addf %7, %13 : vector<8x64xf32>
    %c1_15 = arith.constant 1 : index
    %c0_16 = arith.constant 0 : index
    %c0_17 = arith.constant 0 : index
    %15 = vector.load %arg3[%c1_15, %c0_16, %c0_17] : memref<2x8x8xf32, #tpu.memory_space<vmem>>, vector<1x8x8xf32>
    %16 = vector.shape_cast %15 : vector<1x8x8xf32> to vector<8x8xf32>
    %cst_18 = arith.constant dense<0.000000e+00> : vector<8x64xf32>
    %17 = tpu.matmul %16, %10, %cst_18 {dimension_numbers = #tpu.dot_dimension_numbers<[1], [0], [0], [1], [0, 0, 1, 1], [], []>} : vector<8x8xf32>, vector<8x64xf32>, vector<8x64xf32> -> vector<8x64xf32>
    %18 = arith.addf %14, %17 : vector<8x64xf32>
    %c0_19 = arith.constant 0 : index
    %c0_20 = arith.constant 0 : index
    %19 = vector.load %arg4[%c0_19, %c0_20] : memref<1x64xf32, #tpu.memory_space<vmem>>, vector<1x64xf32>
    %20 = vector.broadcast %19 : vector<1x64xf32> to vector<8x64xf32>
    %21 = arith.addf %18, %20 : vector<8x64xf32>
    %cst_21 = arith.constant 0.000000e+00 : f32
    %22 = vector.broadcast %cst_21 : f32 to vector<8x64xf32>
    %23 = arith.maximumf %21, %22 : vector<8x64xf32>
    %24 = arith.truncf %23 : vector<8x64xf32> to vector<8x64xbf16>
    %c0_22 = arith.constant 0 : index
    %c0_23 = arith.constant 0 : index
    %c0_24 = arith.constant 0 : index
    %25 = vector.load %arg5[%c0_22, %c0_23, %c0_24] : memref<2x64x128xbf16, #tpu.memory_space<vmem>>, vector<1x64x128xbf16>
    %26 = vector.shape_cast %25 : vector<1x64x128xbf16> to vector<64x128xbf16>
    %cst_25 = arith.constant dense<0.000000e+00> : vector<8x128xf32>
    %27 = tpu.matmul %24, %26, %cst_25 {dimension_numbers = #tpu.dot_dimension_numbers<[1], [0], [0], [1], [0, 0, 1, 1], [], []>} : vector<8x64xbf16>, vector<64x128xbf16>, vector<8x128xf32> -> vector<8x128xf32>
    %c1_26 = arith.constant 1 : index
    %c0_27 = arith.constant 0 : index
    %c0_28 = arith.constant 0 : index
    %28 = vector.load %arg5[%c1_26, %c0_27, %c0_28] : memref<2x64x128xbf16, #tpu.memory_space<vmem>>, vector<1x64x128xbf16>
    %29 = vector.shape_cast %28 : vector<1x64x128xbf16> to vector<64x128xbf16>
    %cst_29 = arith.constant dense<0.000000e+00> : vector<8x128xf32>
    %30 = tpu.matmul %24, %29, %cst_29 {dimension_numbers = #tpu.dot_dimension_numbers<[1], [0], [0], [1], [0, 0, 1, 1], [], []>} : vector<8x64xbf16>, vector<64x128xbf16>, vector<8x128xf32> -> vector<8x128xf32>
    %c0_30 = arith.constant 0 : index
    %c0_31 = arith.constant 0 : index
    %c0_32 = arith.constant 0 : index
    %31 = vector.load %arg6[%c0_30, %c0_31, %c0_32] : memref<2x16x8xf32, #tpu.memory_space<vmem>>, vector<1x16x8xf32>
    %32 = vector.shape_cast %31 : vector<1x16x8xf32> to vector<16x8xf32>
    %cst_33 = arith.constant dense<0.000000e+00> : vector<16x128xf32>
    %33 = tpu.matmul %32, %27, %cst_33 {dimension_numbers = #tpu.dot_dimension_numbers<[1], [0], [0], [1], [0, 0, 1, 1], [], []>} : vector<16x8xf32>, vector<8x128xf32>, vector<16x128xf32> -> vector<16x128xf32>
    %c1_34 = arith.constant 1 : index
    %c0_35 = arith.constant 0 : index
    %c0_36 = arith.constant 0 : index
    %34 = vector.load %arg6[%c1_34, %c0_35, %c0_36] : memref<2x16x8xf32, #tpu.memory_space<vmem>>, vector<1x16x8xf32>
    %35 = vector.shape_cast %34 : vector<1x16x8xf32> to vector<16x8xf32>
    %cst_37 = arith.constant dense<0.000000e+00> : vector<16x128xf32>
    %36 = tpu.matmul %35, %30, %cst_37 {dimension_numbers = #tpu.dot_dimension_numbers<[1], [0], [0], [1], [0, 0, 1, 1], [], []>} : vector<16x8xf32>, vector<8x128xf32>, vector<16x128xf32> -> vector<16x128xf32>
    %37 = arith.addf %33, %36 : vector<16x128xf32>
    %c0_38 = arith.constant 0 : index
    %c0_39 = arith.constant 0 : index
    %38 = vector.load %arg7[%c0_38, %c0_39] : memref<1x128xf32, #tpu.memory_space<vmem>>, vector<1x128xf32>
    %39 = vector.broadcast %38 : vector<1x128xf32> to vector<16x128xf32>
    %40 = arith.addf %37, %39 : vector<16x128xf32>
    %41 = arith.truncf %40 : vector<16x128xf32> to vector<16x128xbf16>
    %c0_40 = arith.constant 0 : index
    %c0_41 = arith.constant 0 : index
    %c0_42 = arith.constant 0 : index
    %42 = vector.load %arg8[%c0_40, %c0_41, %c0_42] : memref<3x128x64xbf16, #tpu.memory_space<vmem>>, vector<1x128x64xbf16>
    %43 = vector.shape_cast %42 : vector<1x128x64xbf16> to vector<128x64xbf16>
    %cst_43 = arith.constant dense<0.000000e+00> : vector<16x64xf32>
    %44 = tpu.matmul %41, %43, %cst_43 {dimension_numbers = #tpu.dot_dimension_numbers<[1], [0], [0], [1], [0, 0, 1, 1], [], []>} : vector<16x128xbf16>, vector<128x64xbf16>, vector<16x64xf32> -> vector<16x64xf32>
    %c1_44 = arith.constant 1 : index
    %c0_45 = arith.constant 0 : index
    %c0_46 = arith.constant 0 : index
    %45 = vector.load %arg8[%c1_44, %c0_45, %c0_46] : memref<3x128x64xbf16, #tpu.memory_space<vmem>>, vector<1x128x64xbf16>
    %46 = vector.shape_cast %45 : vector<1x128x64xbf16> to vector<128x64xbf16>
    %cst_47 = arith.constant dense<0.000000e+00> : vector<16x64xf32>
    %47 = tpu.matmul %41, %46, %cst_47 {dimension_numbers = #tpu.dot_dimension_numbers<[1], [0], [0], [1], [0, 0, 1, 1], [], []>} : vector<16x128xbf16>, vector<128x64xbf16>, vector<16x64xf32> -> vector<16x64xf32>
    %c2_48 = arith.constant 2 : index
    %c0_49 = arith.constant 0 : index
    %c0_50 = arith.constant 0 : index
    %48 = vector.load %arg8[%c2_48, %c0_49, %c0_50] : memref<3x128x64xbf16, #tpu.memory_space<vmem>>, vector<1x128x64xbf16>
    %49 = vector.shape_cast %48 : vector<1x128x64xbf16> to vector<128x64xbf16>
    %cst_51 = arith.constant dense<0.000000e+00> : vector<16x64xf32>
    %50 = tpu.matmul %41, %49, %cst_51 {dimension_numbers = #tpu.dot_dimension_numbers<[1], [0], [0], [1], [0, 0, 1, 1], [], []>} : vector<16x128xbf16>, vector<128x64xbf16>, vector<16x64xf32> -> vector<16x64xf32>
    %c0_52 = arith.constant 0 : index
    %c0_53 = arith.constant 0 : index
    %c0_54 = arith.constant 0 : index
    %51 = vector.load %arg9[%c0_52, %c0_53, %c0_54] : memref<2x16x16xf32, #tpu.memory_space<vmem>>, vector<1x16x16xf32>
    %52 = vector.shape_cast %51 : vector<1x16x16xf32> to vector<16x16xf32>
    %cst_55 = arith.constant dense<0.000000e+00> : vector<16x64xf32>
    %53 = tpu.matmul %52, %44, %cst_55 {dimension_numbers = #tpu.dot_dimension_numbers<[1], [0], [0], [1], [0, 0, 1, 1], [], []>} : vector<16x16xf32>, vector<16x64xf32>, vector<16x64xf32> -> vector<16x64xf32>
    %54 = arith.addf %47, %53 : vector<16x64xf32>
    %c1_56 = arith.constant 1 : index
    %c0_57 = arith.constant 0 : index
    %c0_58 = arith.constant 0 : index
    %55 = vector.load %arg9[%c1_56, %c0_57, %c0_58] : memref<2x16x16xf32, #tpu.memory_space<vmem>>, vector<1x16x16xf32>
    %56 = vector.shape_cast %55 : vector<1x16x16xf32> to vector<16x16xf32>
    %cst_59 = arith.constant dense<0.000000e+00> : vector<16x64xf32>
    %57 = tpu.matmul %56, %50, %cst_59 {dimension_numbers = #tpu.dot_dimension_numbers<[1], [0], [0], [1], [0, 0, 1, 1], [], []>} : vector<16x16xf32>, vector<16x64xf32>, vector<16x64xf32> -> vector<16x64xf32>
    %58 = arith.addf %54, %57 : vector<16x64xf32>
    %c0_60 = arith.constant 0 : index
    %c0_61 = arith.constant 0 : index
    %59 = vector.load %arg10[%c0_60, %c0_61] : memref<1x64xf32, #tpu.memory_space<vmem>>, vector<1x64xf32>
    %60 = vector.broadcast %59 : vector<1x64xf32> to vector<16x64xf32>
    %61 = arith.addf %58, %60 : vector<16x64xf32>
    %cst_62 = arith.constant 0.000000e+00 : f32
    %62 = vector.broadcast %cst_62 : f32 to vector<16x64xf32>
    %63 = arith.maximumf %61, %62 : vector<16x64xf32>
    %64 = arith.truncf %63 : vector<16x64xf32> to vector<16x64xbf16>
    %c0_63 = arith.constant 0 : index
    %c0_64 = arith.constant 0 : index
    %c0_65 = arith.constant 0 : index
    %65 = vector.load %arg11[%c0_63, %c0_64, %c0_65] : memref<2x64x128xbf16, #tpu.memory_space<vmem>>, vector<1x64x128xbf16>
    %66 = vector.shape_cast %65 : vector<1x64x128xbf16> to vector<64x128xbf16>
    %cst_66 = arith.constant dense<0.000000e+00> : vector<16x128xf32>
    %67 = tpu.matmul %64, %66, %cst_66 {dimension_numbers = #tpu.dot_dimension_numbers<[1], [0], [0], [1], [0, 0, 1, 1], [], []>} : vector<16x64xbf16>, vector<64x128xbf16>, vector<16x128xf32> -> vector<16x128xf32>
    %c1_67 = arith.constant 1 : index
    %c0_68 = arith.constant 0 : index
    %c0_69 = arith.constant 0 : index
    %68 = vector.load %arg11[%c1_67, %c0_68, %c0_69] : memref<2x64x128xbf16, #tpu.memory_space<vmem>>, vector<1x64x128xbf16>
    %69 = vector.shape_cast %68 : vector<1x64x128xbf16> to vector<64x128xbf16>
    %cst_70 = arith.constant dense<0.000000e+00> : vector<16x128xf32>
    %70 = tpu.matmul %64, %69, %cst_70 {dimension_numbers = #tpu.dot_dimension_numbers<[1], [0], [0], [1], [0, 0, 1, 1], [], []>} : vector<16x64xbf16>, vector<64x128xbf16>, vector<16x128xf32> -> vector<16x128xf32>
    %c0_71 = arith.constant 0 : index
    %c0_72 = arith.constant 0 : index
    %c0_73 = arith.constant 0 : index
    %71 = vector.load %arg12[%c0_71, %c0_72, %c0_73] : memref<2x32x16xf32, #tpu.memory_space<vmem>>, vector<1x32x16xf32>
    %72 = vector.shape_cast %71 : vector<1x32x16xf32> to vector<32x16xf32>
    %cst_74 = arith.constant dense<0.000000e+00> : vector<32x128xf32>
    %73 = tpu.matmul %72, %67, %cst_74 {dimension_numbers = #tpu.dot_dimension_numbers<[1], [0], [0], [1], [0, 0, 1, 1], [], []>} : vector<32x16xf32>, vector<16x128xf32>, vector<32x128xf32> -> vector<32x128xf32>
    %c1_75 = arith.constant 1 : index
    %c0_76 = arith.constant 0 : index
    %c0_77 = arith.constant 0 : index
    %74 = vector.load %arg12[%c1_75, %c0_76, %c0_77] : memref<2x32x16xf32, #tpu.memory_space<vmem>>, vector<1x32x16xf32>
    %75 = vector.shape_cast %74 : vector<1x32x16xf32> to vector<32x16xf32>
    %cst_78 = arith.constant dense<0.000000e+00> : vector<32x128xf32>
    %76 = tpu.matmul %75, %70, %cst_78 {dimension_numbers = #tpu.dot_dimension_numbers<[1], [0], [0], [1], [0, 0, 1, 1], [], []>} : vector<32x16xf32>, vector<16x128xf32>, vector<32x128xf32> -> vector<32x128xf32>
    %77 = arith.addf %73, %76 : vector<32x128xf32>
    %c0_79 = arith.constant 0 : index
    %c0_80 = arith.constant 0 : index
    %78 = vector.load %arg13[%c0_79, %c0_80] : memref<1x128xf32, #tpu.memory_space<vmem>>, vector<1x128xf32>
    %79 = vector.broadcast %78 : vector<1x128xf32> to vector<32x128xf32>
    %80 = arith.addf %77, %79 : vector<32x128xf32>
    %81 = arith.truncf %80 : vector<32x128xf32> to vector<32x128xbf16>
    %c0_81 = arith.constant 0 : index
    %c0_82 = arith.constant 0 : index
    %c0_83 = arith.constant 0 : index
    %82 = vector.load %arg14[%c0_81, %c0_82, %c0_83] : memref<2x128x64xbf16, #tpu.memory_space<vmem>>, vector<1x128x64xbf16>
    %83 = vector.shape_cast %82 : vector<1x128x64xbf16> to vector<128x64xbf16>
    %cst_84 = arith.constant dense<0.000000e+00> : vector<32x64xf32>
    %84 = tpu.matmul %81, %83, %cst_84 {dimension_numbers = #tpu.dot_dimension_numbers<[1], [0], [0], [1], [0, 0, 1, 1], [], []>} : vector<32x128xbf16>, vector<128x64xbf16>, vector<32x64xf32> -> vector<32x64xf32>
    %c1_85 = arith.constant 1 : index
    %c0_86 = arith.constant 0 : index
    %c0_87 = arith.constant 0 : index
    %85 = vector.load %arg14[%c1_85, %c0_86, %c0_87] : memref<2x128x64xbf16, #tpu.memory_space<vmem>>, vector<1x128x64xbf16>
    %86 = vector.shape_cast %85 : vector<1x128x64xbf16> to vector<128x64xbf16>
    %cst_88 = arith.constant dense<0.000000e+00> : vector<32x64xf32>
    %87 = tpu.matmul %81, %86, %cst_88 {dimension_numbers = #tpu.dot_dimension_numbers<[1], [0], [0], [1], [0, 0, 1, 1], [], []>} : vector<32x128xbf16>, vector<128x64xbf16>, vector<32x64xf32> -> vector<32x64xf32>
    %c0_89 = arith.constant 0 : index
    %c0_90 = arith.constant 0 : index
    %c0_91 = arith.constant 0 : index
    %88 = vector.load %arg15[%c0_89, %c0_90, %c0_91] : memref<2x64x32xf32, #tpu.memory_space<vmem>>, vector<1x64x32xf32>
    %89 = vector.shape_cast %88 : vector<1x64x32xf32> to vector<64x32xf32>
    %cst_92 = arith.constant dense<0.000000e+00> : vector<64x64xf32>
    %90 = tpu.matmul %89, %84, %cst_92 {dimension_numbers = #tpu.dot_dimension_numbers<[1], [0], [0], [1], [0, 0, 1, 1], [], []>} : vector<64x32xf32>, vector<32x64xf32>, vector<64x64xf32> -> vector<64x64xf32>
    %c1_93 = arith.constant 1 : index
    %c0_94 = arith.constant 0 : index
    %c0_95 = arith.constant 0 : index
    %91 = vector.load %arg15[%c1_93, %c0_94, %c0_95] : memref<2x64x32xf32, #tpu.memory_space<vmem>>, vector<1x64x32xf32>
    %92 = vector.shape_cast %91 : vector<1x64x32xf32> to vector<64x32xf32>
    %cst_96 = arith.constant dense<0.000000e+00> : vector<64x64xf32>
    %93 = tpu.matmul %92, %87, %cst_96 {dimension_numbers = #tpu.dot_dimension_numbers<[1], [0], [0], [1], [0, 0, 1, 1], [], []>} : vector<64x32xf32>, vector<32x64xf32>, vector<64x64xf32> -> vector<64x64xf32>
    %94 = arith.addf %90, %93 : vector<64x64xf32>
    %c0_97 = arith.constant 0 : index
    %c0_98 = arith.constant 0 : index
    %95 = vector.load %arg16[%c0_97, %c0_98] : memref<1x64xf32, #tpu.memory_space<vmem>>, vector<1x64xf32>
    %96 = vector.broadcast %95 : vector<1x64xf32> to vector<64x64xf32>
    %97 = arith.addf %94, %96 : vector<64x64xf32>
    %c0_99 = arith.constant 0 : index
    %c0_100 = arith.constant 0 : index
    %98 = vector.load %arg17[%c0_99, %c0_100] : memref<16x64xf32, #tpu.memory_space<vmem>>, vector<16x64xf32>
    %c0_101 = arith.constant 0 : index
    %c0_102 = arith.constant 0 : index
    %99 = vector.load %arg18[%c0_101, %c0_102] : memref<64x16xf32, #tpu.memory_space<vmem>>, vector<64x16xf32>
    %cst_103 = arith.constant dense<0.000000e+00> : vector<64x16xf32>
    %100 = tpu.matmul %97, %99, %cst_103 {dimension_numbers = #tpu.dot_dimension_numbers<[1], [0], [0], [1], [0, 0, 1, 1], [], []>} : vector<64x64xf32>, vector<64x16xf32>, vector<64x16xf32> -> vector<64x16xf32>
    %cst_104 = arith.constant dense<0.000000e+00> : vector<16x16xf32>
    %101 = tpu.matmul %98, %100, %cst_104 {dimension_numbers = #tpu.dot_dimension_numbers<[1], [0], [0], [1], [0, 0, 1, 1], [], []>} : vector<16x64xf32>, vector<64x16xf32>, vector<16x16xf32> -> vector<16x16xf32>
    %102 = arith.negf %101 : vector<16x16xf32>
    %103 = math.exp %102 : vector<16x16xf32>
    %cst_105 = arith.constant 1.000000e+00 : f32
    %104 = vector.broadcast %cst_105 : f32 to vector<16x16xf32>
    %105 = arith.addf %104, %103 : vector<16x16xf32>
    %106 = arith.divf %104, %105 : vector<16x16xf32>
    %c0_106 = arith.constant 0 : index
    %c0_107 = arith.constant 0 : index
    %c0_108 = arith.constant 0 : index
    %107 = vector.load %arg19[%c0_106, %c0_107, %c0_108] : memref<1x16x16xf32, #tpu.memory_space<vmem>>, vector<1x16x16xf32>
    %108 = vector.shape_cast %107 : vector<1x16x16xf32> to vector<16x16xf32>
    %109 = vector.shape_cast %106 : vector<16x16xf32> to vector<1x16x16xf32>
    tpu.vector_store %arg19[%c0_106, %c0_107, %c0_108], %109 {strides = array<i32>} : memref<1x16x16xf32, #tpu.memory_space<vmem>>, vector<1x16x16xf32>,
    return
  }
  func.func @transform_0(%arg0: i32) -> (i32, i32, i32) {
    %c0_i32 = arith.constant 0 : i32
    %c0_i32_0 = arith.constant 0 : i32
    %c0_i32_1 = arith.constant 0 : i32
    return %arg0, %c0_i32, %c0_i32_0 : i32, i32, i32
  }
  func.func @transform_1(%arg0: i32) -> (i32, i32, i32) {
    %c0_i32 = arith.constant 0 : i32
    %c0_i32_0 = arith.constant 0 : i32
    %c0_i32_1 = arith.constant 0 : i32
    %c0_i32_2 = arith.constant 0 : i32
    return %c0_i32, %c0_i32_0, %c0_i32_1 : i32, i32, i32
  }
  func.func @transform_2(%arg0: i32) -> (i32, i32, i32) {
    %c0_i32 = arith.constant 0 : i32
    %c0_i32_0 = arith.constant 0 : i32
    %c0_i32_1 = arith.constant 0 : i32
    %c0_i32_2 = arith.constant 0 : i32
    return %c0_i32, %c0_i32_0, %c0_i32_1 : i32, i32, i32
  }
  func.func @transform_3(%arg0: i32) -> (i32, i32) {
    %c0_i32 = arith.constant 0 : i32
    %c0_i32_0 = arith.constant 0 : i32
    %c0_i32_1 = arith.constant 0 : i32
    return %c0_i32, %c0_i32_0 : i32, i32
  }
  func.func @transform_4(%arg0: i32) -> (i32, i32, i32) {
    %c0_i32 = arith.constant 0 : i32
    %c0_i32_0 = arith.constant 0 : i32
    %c0_i32_1 = arith.constant 0 : i32
    %c0_i32_2 = arith.constant 0 : i32
    return %c0_i32, %c0_i32_0, %c0_i32_1 : i32, i32, i32
  }
  func.func @transform_5(%arg0: i32) -> (i32, i32, i32) {
    %c0_i32 = arith.constant 0 : i32
    %c0_i32_0 = arith.constant 0 : i32
    %c0_i32_1 = arith.constant 0 : i32
    %c0_i32_2 = arith.constant 0 : i32
    return %c0_i32, %c0_i32_0, %c0_i32_1 : i32, i32, i32
  }
  func.func @transform_6(%arg0: i32) -> (i32, i32) {
    %c0_i32 = arith.constant 0 : i32
    %c0_i32_0 = arith.constant 0 : i32
    %c0_i32_1 = arith.constant 0 : i32
    return %c0_i32, %c0_i32_0 : i32, i32
  }
  func.func @transform_7(%arg0: i32) -> (i32, i32, i32) {
    %c0_i32 = arith.constant 0 : i32
    %c0_i32_0 = arith.constant 0 : i32
    %c0_i32_1 = arith.constant 0 : i32
    %c0_i32_2 = arith.constant 0 : i32
    return %c0_i32, %c0_i32_0, %c0_i32_1 : i32, i32, i32
  }
  func.func @transform_8(%arg0: i32) -> (i32, i32, i32) {
    %c0_i32 = arith.constant 0 : i32
    %c0_i32_0 = arith.constant 0 : i32
    %c0_i32_1 = arith.constant 0 : i32
    %c0_i32_2 = arith.constant 0 : i32
    return %c0_i32, %c0_i32_0, %c0_i32_1 : i32, i32, i32
  }
  func.func @transform_9(%arg0: i32) -> (i32, i32) {
    %c0_i32 = arith.constant 0 : i32
    %c0_i32_0 = arith.constant 0 : i32
    %c0_i32_1 = arith.constant 0 : i32
    return %c0_i32, %c0_i32_0 : i32, i32
  }
  func.func @transform_10(%arg0: i32) -> (i32, i32, i32) {
    %c0_i32 = arith.constant 0 : i32
    %c0_i32_0 = arith.constant 0 : i32
    %c0_i32_1 = arith.constant 0 : i32
    %c0_i32_2 = arith.constant 0 : i32
    return %c0_i32, %c0_i32_0, %c0_i32_1 : i32, i32, i32
  }
  func.func @transform_11(%arg0: i32) -> (i32, i32, i32) {
    %c0_i32 = arith.constant 0 : i32
    %c0_i32_0 = arith.constant 0 : i32
    %c0_i32_1 = arith.constant 0 : i32
    %c0_i32_2 = arith.constant 0 : i32
    return %c0_i32, %c0_i32_0, %c0_i32_1 : i32, i32, i32
  }
  func.func @transform_12(%arg0: i32) -> (i32, i32) {
    %c0_i32 = arith.constant 0 : i32
    %c0_i32_0 = arith.constant 0 : i32
    %c0_i32_1 = arith.constant 0 : i32
    return %c0_i32, %c0_i32_0 : i32, i32
  }
  func.func @transform_13(%arg0: i32) -> (i32, i32, i32) {
    %c0_i32 = arith.constant 0 : i32
    %c0_i32_0 = arith.constant 0 : i32
    %c0_i32_1 = arith.constant 0 : i32
    %c0_i32_2 = arith.constant 0 : i32
    return %c0_i32, %c0_i32_0, %c0_i32_1 : i32, i32, i32
  }
  func.func @transform_14(%arg0: i32) -> (i32, i32, i32) {
    %c0_i32 = arith.constant 0 : i32
    %c0_i32_0 = arith.constant 0 : i32
    %c0_i32_1 = arith.constant 0 : i32
    %c0_i32_2 = arith.constant 0 : i32
    return %c0_i32, %c0_i32_0, %c0_i32_1 : i32, i32, i32
  }
  func.func @transform_15(%arg0: i32) -> (i32, i32) {
    %c0_i32 = arith.constant 0 : i32
    %c0_i32_0 = arith.constant 0 : i32
    %c0_i32_1 = arith.constant 0 : i32
    return %c0_i32, %c0_i32_0 : i32, i32
  }
  func.func @transform_16(%arg0: i32) -> (i32, i32) {
    %c0_i32 = arith.constant 0 : i32
    %c0_i32_0 = arith.constant 0 : i32
    %c0_i32_1 = arith.constant 0 : i32
    return %c0_i32, %c0_i32_0 : i32, i32
  }
  func.func @transform_17(%arg0: i32) -> (i32, i32) {
    %c0_i32 = arith.constant 0 : i32
    %c0_i32_0 = arith.constant 0 : i32
    %c0_i32_1 = arith.constant 0 : i32
    return %c0_i32, %c0_i32_0 : i32, i32
  }
  func.func @transform_18(%arg0: i32) -> (i32, i32, i32) {
    %c0_i32 = arith.constant 0 : i32
    %c0_i32_0 = arith.constant 0 : i32
    %c0_i32_1 = arith.constant 0 : i32
    return %arg0, %c0_i32, %c0_i32_0 : i32, i32, i32
  }
}

</mosaic_0001>

<bundles_post_ra>
// kernel: decoder_forward.1
= control target key start
LH: loop header
LB: loop body
LE: loop exit
PB: predicated region body
PF: predicated region fallthrough
CT: control target
= control target key end

     0   :  { %s3402_s0 = inlined_call_operand.vmem [shape: bf16[2,8,128], index: 0, kind: input, shape index: {}]   ;;  %s3403_s1 = inlined_call_operand.vmem [shape: bf16[3,128,64], index: 1, kind: input, shape index: {}]   ;;  %s3404_s2 = inlined_call_operand.vmem [shape: f32[2,8,8], index: 2, kind: input, shape index: {}]   ;;  %s3405_s3 = inlined_call_operand.vmem [shape: f32[1,64], index: 3, kind: input, shape index: {}]   ;;  %s3406_s4 = inlined_call_operand.vmem [shape: bf16[2,64,128], index: 4, kind: input, shape index: {}]   ;;  %s3407_s5 = inlined_call_operand.vmem [shape: f32[2,16,8], index: 5, kind: input, shape index: {}]   ;;  %s3408_s6 = inlined_call_operand.vmem [shape: f32[1,128], index: 6, kind: input, shape index: {}]   ;;  %s3409_s7 = inlined_call_operand.vmem [shape: bf16[3,128,64], index: 7, kind: input, shape index: {}]   ;;  %s3410_s8 = inlined_call_operand.vmem [shape: f32[2,16,16], index: 8, kind: input, shape index: {}]   ;;  %s3411_s9 = inlined_call_operand.vmem [shape: f32[1,64], index: 9, kind: input, shape index: {}]   ;;  %s3412_s10 = inlined_call_operand.vmem [shape: bf16[2,64,128], index: 10, kind: input, shape index: {}]   ;;  %s3413_s11 = inlined_call_operand.vmem [shape: f32[2,32,16], index: 11, kind: input, shape index: {}]   ;;  %s3414_s12 = inlined_call_operand.vmem [shape: f32[1,128], index: 12, kind: input, shape index: {}]   ;;  %s3415_s13 = inlined_call_operand.vmem [shape: bf16[2,128,64], index: 13, kind: input, shape index: {}]   ;;  %s3416_s14 = inlined_call_operand.vmem [shape: f32[2,64,32], index: 14, kind: input, shape index: {}]   ;;  %s3417_s15 = inlined_call_operand.vmem [shape: f32[1,64], index: 15, kind: input, shape index: {}]   ;;  %s3418_s16 = inlined_call_operand.vmem [shape: f32[16,64], index: 16, kind: input, shape index: {}]   ;;  %s3419_s17 = inlined_call_operand.vmem [shape: f32[64,16], index: 17, kind: input, shape index: {}]   ;;  %s3420_s18 = inlined_call_operand.hbm [shape: f32[2,16,16], index: 18, kind: output, shape index: {}]  }
   0x1   :  { %3433 = sst [smem:[#allocation13_spill]] %s3402_s0 }
   0x2   :  { %3434 = sst [smem:[#allocation14_spill]] %s3403_s1 }
   0x3   :  { %3435 = sst [smem:[#allocation15_spill]] %s3404_s2 }
   0x4   :  { %3436 = sst [smem:[#allocation16_spill]] %s3405_s3 }
   0x5   :  { %3437 = sst [smem:[#allocation17_spill]] %s3406_s4 }
   0x6   :  { %3438 = sst [smem:[#allocation18_spill]] %s3407_s5 }
   0x7   :  { %3439 = sst [smem:[#allocation19_spill]] %s3408_s6 }
   0x8   :  { %3440 = sst [smem:[#allocation20_spill]] %s3420_s18 }
   0x9   :  { %23 = vsyncpa [#allocation3], 0 }
   0xa   :  { %25 = vsyncpa [#allocation3 + $0x1], 0  ;;  %s2876_s27 = smov 0   ;;  %s2878_s28 = smov 0  }
   0xb   :  { %s2880_s29 = smov 0   ;;  %s2882_s30 = smov 0  }
   0xc LB: > { %3441 = sst [smem:[#allocation5_spill]] %s2765_s27  ;;  %s2897_s0 = sadd.s32 4294967295, %s2777_s30   ;;  %s2777_s30 = sphi %s2882_s30, %s3465_s30   ;;  %s2773_s29 = sphi %s2880_s29, %s3467_s29   ;;  %s2769_s28 = sphi %s2878_s28, %s3469_s28   ;;  %s2765_s27 = sphi %s2876_s27, %s3468_s27  }
   0xd   : > { %3442 = sst [smem:[#allocation6_spill]] %s2773_s29  ;;  %s2086_s19 = sadd.s32 4294967294, %s2777_s30  }
   0xe   : > { %3443 = sst [smem:[#allocation7_spill]] %s2777_s30  ;;  %s2901_s1 = sadd.s32 1, %s2777_s30  }
   0xf   : > { %3444 = sst [smem:[#allocation8_spill]] %s2897_s0  ;;  %s421_s20 = sadd.s32 1, %s2773_s29 }
  0x10   : > { %3445 = sst [smem:[#allocation9_spill]] %s2901_s1  ;;  %s418_s21 = ssub.s32 %s2777_s30, %s2901_s1 }
  0x11   : > { %p431_p0 = scmp.ne.s32.totalorder %s2773_s29, %s2769_s28  ;;  %p419_p1 = scmp.eq.s32.totalorder %s418_s21, 0 }
  0x12   : > { %p432_p2 = scmp.eq.s32.totalorder %s2897_s0, 1  ;;  %p437_p3 = scmp.ne.s32.totalorder %s2769_s28, %s2765_s27 }
  0x13   : > { %p438_p4 = scmp.eq.s32.totalorder %s2086_s19, 1  ;;  %p2089_p7 = scmp.ge.s32.totalorder %s2777_s30, 1 }
  0x14   : > { %s2912_s22 = scalar_select %p419_p1, %s2773_s29, %s421_s20  }
  0x15   : > { %p2914_p5 = por %p432_p2, %p431_p0  ;;  %p2918_p6 = por %p438_p4, %p437_p3 }
  0x16   : > { %3446 = sst [smem:[#allocation10_spill]] %s2912_s22  ;;  %p514_p8 = scmp.lt.s32.totalorder %s2777_s30, 3 }
  0x17   : > { %s3447_s2 = scalar_select %p2914_p5, 1, 0 }
  0x18   : > { %s3449_s23 = scalar_select %p2918_p6, 1, 0 }
  0x19   : > { %3448 = sst [smem:[#allocation11_spill]] %s3447_s2  ;;  %p515_p9 = pnand %p2089_p7, %p514_p8 }
  0x1a   : > { %3450 = sst [smem:[#allocation12_spill]] %s3449_s23  ;;  %p567_p10 = scmp.lt.s32.totalorder (!%p515_p9), %s2897_s0, 1 }
  0x1b   : > { %518 = sbr.rel (%p515_p9) target bundleno = 1897 (0x769), region = 92  ;;  %s3451_s26 = sld [smem:[#allocation14_spill]] (!%p515_p9) }
  0x1c   : > { %s3452_s30 = sld [smem:[#allocation13_spill]] (!%p515_p9) }
  0x1d   : > { %s3454_s4 = sld [smem:[#allocation17_spill]] (!%p515_p9) }
  0x1e   : > { %s3455_s3 = sld [smem:[#allocation16_spill]] (!%p515_p9) }
  0x1f   : > { %s3456_s5 = sld [smem:[#allocation18_spill]] (!%p515_p9) }
  0x20   : > { %s568_s22 = scalar_select %p567_p10, %s2897_s0, 1  ;;  %vm746_vm0 = vcmask 64512   ;;  %vm896_vm1 = vcmask 523264   ;;  %v2619_v49 = vld [vmem:[%s3409_s7 + $0x38] sm:$0xff]  ;;  %v2618_v51 = vld [vmem:[%s3409_s7 + $0x30] sm:$0xff]  ;;  %v2617_v56 = vld [vmem:[%s3409_s7 + $0x28] sm:$0xff] }
  0x21   : > { %v2587_v0 = vld [vmem:[%s3451_s26 + $0x38] sm:$0xff]  ;;  %v2586_v2 = vld [vmem:[%s3451_s26 + $0x30] sm:$0xff]  ;;  %v2585_v5 = vld [vmem:[%s3451_s26 + $0x28] sm:$0xff]  ;;  %s3457_s6 = sld [smem:[#allocation19_spill]]  ;;  %vm1205_vm2 = vcmask 130048   ;;  %vm1721_vm3 = vcmask 261120  }
  0x22   : > { %v2603_v1 = vld [vmem:[%s3451_s26 + $0xb8] sm:$0xff]  ;;  %637 = vmatpush.bf16.msra.mxu0 %v2587_v0  ;;  %v2602_v3 = vld [vmem:[%s3451_s26 + $0xb0] sm:$0xff]  ;;  %v2601_v6 = vld [vmem:[%s3451_s26 + $0xa8] sm:$0xff]  ;;  %s2091_s24 = sshll.u32 %s568_s22, 2  ;;  %s3458_s18 = sld [smem:[#allocation8_spill]] }
  0x23   : > { %732 = vmatpush.bf16.msra.mxu1 %v2603_v1  ;;  %v2595_v4 = vld [vmem:[%s3451_s26 + $0x78] sm:$0xff]  ;;  %v2594_v7 = vld [vmem:[%s3451_s26 + $0x70] sm:$0xff]  ;;  %v2584_v8 = vld [vmem:[%s3451_s26 + $0x20] sm:$0xff]  ;;  %s570_s29 = scalar_lea.vmem %s3452_s30, %s2091_s24  ;;  %s3453_s24 = sld [smem:[#allocation15_spill]] }
  0x24   : > { %818 = vmatpush.bf16.msra.mxu3 %v2595_v4  ;;  %v2600_v9 = vld [vmem:[%s3451_s26 + $0xa0] sm:$0xff]  ;;  %v2593_v10 = vld [vmem:[%s3451_s26 + $0x68] sm:$0xff]  ;;  %v2583_v11 = vld [vmem:[%s3451_s26 + $0x18] sm:$0xff]  ;;  %s564_s0 = sand.u32 1, %s2769_s28   ;;  %s3459_s27 = sld [smem:[#allocation20_spill]] }
  0x25   : > { %v2599_v12 = vld [vmem:[%s3451_s26 + $0x98] sm:$0xff]  ;;  %v2592_v13 = vld [vmem:[%s3451_s26 + $0x60] sm:$0xff]  ;;  %v2582_v14 = vld [vmem:[%s3451_s26 + $0x10] sm:$0xff]  ;;  %s2090_s25 = sshll.u32 %s564_s0, 4 }
  0x26   : > { %638 = vmatpush.bf16.msra.mxu0 %v2586_v2  ;;  %v2598_v15 = vld [vmem:[%s3451_s26 + $0x90] sm:$0xff]  ;;  %v2591_v16 = vld [vmem:[%s3451_s26 + $0x58] sm:$0xff]  ;;  %v2581_v17 = vld [vmem:[%s3451_s26 + $0x8] sm:$0xff] }
  0x27   : > { %733 = vmatpush.bf16.msra.mxu1 %v2602_v3  ;;  %v2597_v18 = vld [vmem:[%s3451_s26 + $0x88] sm:$0xff]  ;;  %v2590_v19 = vld [vmem:[%s3451_s26 + $0x50] sm:$0xff]  ;;  %v2580_v20 = vld [vmem:[%s3451_s26] sm:$0xff] }
  0x28   : > { %819 = vmatpush.bf16.msra.mxu3 %v2594_v7  ;;  %v2596_v21 = vld [vmem:[%s3451_s26 + $0x80] sm:$0xff]  ;;  %v2589_v22 = vld [vmem:[%s3451_s26 + $0x48] sm:$0xff]  ;;  %v2607_v33 = vld [vmem:[%s3454_s4 + $0x18] sm:$0xff]  ;;  %s2660_s21 = sshll.u32 %s3458_s18, 4  ;;  %s2009_s18 = scalar_lea.sflag [#allocation3], %s564_s0 }
  0x29   : > { %v572_v23 = vld [vmem:[%s570_s29] sm:$0xf]  ;;  %v2221_v28 = vld [vmem:[%s3453_s24 + $0x8] sm:$0xff]  ;;  %v2606_v34 = vld [vmem:[%s3454_s4 + $0x10] sm:$0xff]  ;;  %s566_s29 = scalar_lea.vmem [#allocation2], %s2090_s25 }
  0x2a   : > { %639 = vmatpush.bf16.msra.mxu0 %v2585_v5  ;;  %v2588_v24 = vld [vmem:[%s3451_s26 + $0x40] sm:$0xff]  ;;  %v2605_v35 = vld [vmem:[%s3454_s4 + $0x8] sm:$0xff]  ;;  %v2611_v37 = vld [vmem:[%s3454_s4 + $0x38] sm:$0xff]  ;;  %s3460_s22 = smov %s3459_s27  ;;  %s2020_s30 = scalar_lea.hbm %s3459_s27, %s2660_s21 }
  0x2b   : > { %734 = vmatpush.bf16.msra.mxu1 %v2601_v6  ;;  %v745_v25 = vld [vmem:[%s3453_s24] sm:$0xff]  ;;  %v2610_v38 = vld [vmem:[%s3454_s4 + $0x30] sm:$0xff]  ;;  %v2609_v39 = vld [vmem:[%s3454_s4 + $0x28] sm:$0xff]  ;;  %s2021_s1 = sshll.u32 %s566_s29, 4  ;;  %s2023_s2 = sshll.u32 %s2020_s30, 4  ;;  %s2022_s1 = int_to_ptr.vmem [resolvable:$true] %s2021_s1  ;;  %s2024_s2 = int_to_ptr.hbm [resolvable:$true] %s2023_s2 }
  0x2c   : > { %820 = vmatpush.bf16.msra.mxu3 %v2593_v10  ;;  %v2604_v36 = vld [vmem:[%s3454_s4] sm:$0xff]  ;;  %v2635_v50 = vld [vmem:[%s3409_s7 + $0xb8] sm:$0xff]  ;;  %v2634_v52 = vld [vmem:[%s3409_s7 + $0xb0] sm:$0xff]  ;;  %s2729_s25 = sshra.s32 %s2024_s2, 4  ;;  %s2735_s27 = scalar_lea.hbm %s3460_s22, 32  ;;  %s2730_s25 = int_to_ptr.hbm [resolvable:$true] %s2729_s25 }
  0x2d   : > { %v2608_v40 = vld [vmem:[%s3454_s4 + $0x20] sm:$0xff]  ;;  %v2627_v54 = vld [vmem:[%s3409_s7 + $0x78] sm:$0xff]  ;;  %v2633_v57 = vld [vmem:[%s3409_s7 + $0xa8] sm:$0xff]  ;;  %s2731_s21 = scalar_lea.hbm %s2730_s25, 16  ;;  %p2736_p0 = scmp.lt.s32.totalorder %s2730_s25, %s3460_s22 }
  0x2e   : > { %640 = vmatpush.bf16.msra.mxu0 %v2584_v8  ;;  %v2702_v43 = vld [vmem:[%s3455_s3] ss:$0 sm:$0xff]  ;;  %v2626_v58 = vld [vmem:[%s3409_s7 + $0x70] sm:$0xff]  ;;  %v960_v61 = vld [vmem:[%s3456_s5 + $0x8] sm:$0xff]  ;;  %p2732_p11 = scmp.ne.s32.totalorder %s2730_s25, %s2731_s21  ;;  %p2737_p1 = scmp.lt.s32.totalorder %s2735_s27, %s2731_s21 }
  0x2f   : > { %735 = vmatpush.bf16.msra.mxu1 %v2600_v9  ;;  %v959_v53 = vld [vmem:[%s3456_s5] sm:$0xff]  ;;  %v2625_v62 = vld [vmem:[%s3409_s7 + $0x68] sm:$0xff]  ;;  %v2265_v1 = vld [vmem:[%s3456_s5 + $0x10] sm:$0xff] }
  0x30   : > { %821 = vmatpush.bf16.msra.mxu3 %v2592_v13  ;;  %v2616_v59 = vld [vmem:[%s3409_s7 + $0x20] sm:$0xff]  ;;  %v2266_v3 = vld [vmem:[%s3456_s5 + $0x18] sm:$0xff]  ;;  %v2614_v8 = vld [vmem:[%s3409_s7 + $0x10] sm:$0xff]  ;;  %p2733_p12 = pnand %p2732_p11, %p2914_p5  ;;  %p2738_p2 = por %p2737_p1, %p2736_p0 }
  0x31   : > { %v2632_v60 = vld [vmem:[%s3409_s7 + $0xa0] sm:$0xff]  ;;  %v2615_v5 = vld [vmem:[%s3409_s7 + $0x18] sm:$0xff]  ;;  %v2630_v9 = vld [vmem:[%s3409_s7 + $0x90] sm:$0xff] }
  0x32   : > { %641 = vmatpush.bf16.msra.mxu0 %v2583_v11  ;;  %v2624_v0 = vld [vmem:[%s3409_s7 + $0x60] sm:$0xff]  ;;  %v2631_v6 = vld [vmem:[%s3409_s7 + $0x98] sm:$0xff]  ;;  %v2622_v10 = vld [vmem:[%s3409_s7 + $0x50] sm:$0xff]  ;;  %p2734_p13 = pneg %p2733_p12 }
  0x33   : > { %736 = vmatpush.bf16.msra.mxu1 %v2599_v12  ;;  %v2623_v7 = vld [vmem:[%s3409_s7 + $0x58] sm:$0xff]  ;;  %v2613_v11 = vld [vmem:[%s3409_s7 + $0x8] sm:$0xff] }
  0x34   : > { %822 = vmatpush.bf16.msra.mxu3 %v2591_v16  ;;  %v2629_v12 = vld [vmem:[%s3409_s7 + $0x88] sm:$0xff]  ;;  %v2620_v16 = vld [vmem:[%s3409_s7 + $0x40] sm:$0xff]  ;;  %p2739_p3 = pnand %p2738_p2, %p2734_p13 }
  0x35   : > { %v2621_v13 = vld [vmem:[%s3409_s7 + $0x48] sm:$0xff] }
  0x36   : > { %642 = vmatpush.bf16.msra.mxu0 %v2582_v14  ;;  %v2612_v14 = vld [vmem:[%s3409_s7] sm:$0xff] }
  0x37   : > { %737 = vmatpush.bf16.msra.mxu1 %v2598_v15  ;;  %v2628_v15 = vld [vmem:[%s3409_s7 + $0x80] sm:$0xff] }
  0x38   : > { %823 = vmatpush.bf16.msra.mxu3 %v2590_v19 }
  0x3a   : > { %643 = vmatpush.bf16.msra.mxu0 %v2581_v17 }
  0x3b   : > { %738 = vmatpush.bf16.msra.mxu1 %v2597_v18 }
  0x3c   : > { %824 = vmatpush.bf16.msra.mxu3 %v2589_v22 }
  0x3e   : > { %644 = vmatpush.bf16.msra.mxu0 %v2580_v20 }
  0x3f   : > { %739 = vmatpush.bf16.msra.mxu1 %v2596_v21  ;;  %v2703_v21 = vld [vmem:[%s3457_s6] ss:$0 sm:$0xff] }
  0x40   : > { %825 = vmatpush.bf16.msra.mxu3 %v2588_v24 }
  0x41   : > { %645 = vmatmul.bf16.vlgmr.msra.gmra.mxu0 %v572_v23 }
  0x42   : > { %740 = vmatmul.bf16.vlgmr.msra.gmra.mxu1 %v572_v23 }
  0x43   : > { %826 = vmatmul.bf16.vlgmr.msra.gmra.mxu3 %v572_v23 }
  0x44   : > { %1093 = vmatpush.bf16.msrb.mxu3 %v2619_v49  ;;  %v2704_v49 = vld [vmem:[%s3411_s9] ss:$0 sm:$0xff] }
  0x48   : > { %1094 = vmatpush.bf16.msrb.mxu3 %v2618_v51 }
  0x4c   : > { %1095 = vmatpush.bf16.msrb.mxu3 %v2617_v56 }
  0x50   : > { %1096 = vmatpush.bf16.msrb.mxu3 %v2616_v59 }
  0x54   : > { %1097 = vmatpush.bf16.msrb.mxu3 %v2615_v5  ;;  %v2447_v5 = vld [vmem:[%s3413_s11 + $0x20] sm:$0xff] }
  0x58   : > { %1098 = vmatpush.bf16.msrb.mxu3 %v2614_v8  ;;  %v2657_v8 = vld [vmem:[%s3415_s13 + $0x68] sm:$0xff] }
  0x5c   : > { %1099 = vmatpush.bf16.msrb.mxu3 %v2613_v11  ;;  %v2448_v11 = vld [vmem:[%s3413_s11 + $0x28] sm:$0xff] }
  0x60   : > { %1100 = vmatpush.bf16.msrb.mxu3 %v2612_v14  ;;  %v2450_v14 = vld [vmem:[%s3413_s11 + $0x38] sm:$0xff] }
  0xbe   : > { %v646_v26 = vpop.f32.mrf.mxu0 }
  0xbf   : > { %v741_v27 = vpop.f32.mrf.mxu1  ;;  %765 = vmatpush.msra.mxu2 %v646_v26 }
  0xc0   : > { %2188 = vmatmul.msk.f32.vlgmr.msra.gmra.mxu2 %vm746_vm0, %v745_v25 }
  0xc1   : > { %851 = vmatpush.msrb.mxu2 %v741_v27 }
  0xc3   : > { %904 = vmatpush.bf16.msra.mxu2 %v2607_v33  ;;  %v2401_v33 = vld [vmem:[%s3410_s8 + $0x10] sm:$0xff] }
  0xc6   : > { %v648_v29 = vpop.f32.mrf.mxu0  ;;  %v827_v31 = vpop.f32.mrf.mxu3 }
  0xc7   : > { %v743_v30 = vpop.f32.mrf.mxu1  ;;  %905 = vmatpush.bf16.msra.mxu2 %v2606_v34  ;;  %v2402_v34 = vld [vmem:[%s3410_s8 + $0x18] sm:$0xff] }
  0xc8   : > { %2222 = vmatmul.msk.f32.vlgmr.msrb.gmra.mxu2 %vm746_vm0, %v2221_v28  ;;  %v1203_v30 = vld [vmem:[%s3410_s8] sm:$0xff] }
  0xcb   : > { %906 = vmatpush.bf16.msra.mxu2 %v2605_v35  ;;  %v2639_v35 = vld [vmem:[%s3412_s10 + $0x18] sm:$0xff] }
  0xce   : > { %v829_v32 = vpop.f32.mrf.mxu3 }
  0xcf   : > { %907 = vmatpush.bf16.msra.mxu2 %v2604_v36  ;;  %v1204_v32 = vld [vmem:[%s3410_s8 + $0x8] sm:$0xff]  ;;  %v2638_v36 = vld [vmem:[%s3412_s10 + $0x10] sm:$0xff] }
  0xd3   : > { %950 = vmatpush.bf16.msrb.mxu2 %v2611_v37  ;;  %v2637_v37 = vld [vmem:[%s3412_s10 + $0x8] sm:$0xff] }
  0xd7   : > { %951 = vmatpush.bf16.msrb.mxu2 %v2610_v38  ;;  %v2636_v38 = vld [vmem:[%s3412_s10] sm:$0xff] }
  0xdb   : > { %952 = vmatpush.bf16.msrb.mxu2 %v2609_v39 }
  0xdf   : > { %953 = vmatpush.bf16.msrb.mxu2 %v2608_v40  ;;  %v2643_v40 = vld [vmem:[%s3412_s10 + $0x38] sm:$0xff] }
 0x143   : > { %v767_v41 = vpop.f32.mrf.mxu2 }
 0x144   : > { %v828_v42 = vadd.f32 %v827_v31, %v767_v41  ;;  %v2642_v41 = vld [vmem:[%s3412_s10 + $0x30] sm:$0xff] }
 0x14b   : > { %v853_v44 = vpop.f32.mrf.mxu2 }
 0x14c   : > { %v856_v45 = vadd.f32 %v853_v44, %v828_v42  ;;  %v2641_v42 = vld [vmem:[%s3412_s10 + $0x28] sm:$0xff]  ;;  %v2640_v44 = vld [vmem:[%s3412_s10 + $0x20] sm:$0xff] }
 0x14e   : > { %v861_v46 = vadd.f32 %v2702_v43, %v856_v45 }
 0x150   : > { %v862_v47 = vmax.f32 %v861_v46, 0.0 }
 0x152   : > { %v863_v48 = vpack.c.bf16 %v862_v47, %v862_v47 }
 0x154   : > { %2239 = vmatmul.msk.bf16.vlgmr.msra.gmra.mxu2 %vm896_vm1, %v863_v48 }
 0x155   : > { %1189 = vmatpush.bf16.msra.mxu2 %v2635_v50 }
 0x159   : > { %1190 = vmatpush.bf16.msra.mxu2 %v2634_v52 }
 0x15d   : > { %1191 = vmatpush.bf16.msra.mxu2 %v2633_v57 }
 0x161   : > { %1192 = vmatpush.bf16.msra.mxu2 %v2632_v60 }
 0x164   : > { %2264 = vmatmul.msk.bf16.vlgmr.msrb.gmra.mxu2 %vm896_vm1, %v863_v48 }
 0x165   : > { %1193 = vmatpush.bf16.msra.mxu2 %v2631_v6  ;;  %v1438_v6 = vld [vmem:[%s3413_s11 + $0x10] sm:$0xff] }
 0x169   : > { %1194 = vmatpush.bf16.msra.mxu2 %v2630_v9  ;;  %v2648_v9 = vld [vmem:[%s3415_s13 + $0x20] sm:$0xff] }
 0x16d   : > { %1195 = vmatpush.bf16.msra.mxu2 %v2629_v12  ;;  %v1439_v12 = vld [vmem:[%s3413_s11 + $0x18] sm:$0xff] }
 0x171   : > { %1196 = vmatpush.bf16.msra.mxu2 %v2628_v15  ;;  %v2647_v15 = vld [vmem:[%s3415_s13 + $0x18] sm:$0xff] }
 0x175   : > { %1379 = vmatpush.bf16.msrb.mxu2 %v2639_v35 }
 0x179   : > { %1380 = vmatpush.bf16.msrb.mxu2 %v2638_v36 }
 0x17d   : > { %1381 = vmatpush.bf16.msrb.mxu2 %v2637_v37 }
 0x181   : > { %1382 = vmatpush.bf16.msrb.mxu2 %v2636_v38 }
 0x1d7   : > { %v909_v55 = vpop.f32.mrf.mxu2 }
 0x1d8   : > { %1014 = vmatpush.msrb.mxu1 %v909_v55 }
 0x1d9   : > { %2269 = vmatmul.msk.f32.vlgmr.msrb.gmra.mxu1 %vm746_vm0, %v959_v53 }
 0x1da   : > { %1283 = vmatpush.bf16.msra.mxu1 %v2627_v54 }
 0x1de   : > { %1284 = vmatpush.bf16.msra.mxu1 %v2626_v58 }
 0x1df   : > { %v911_v63 = vpop.f32.mrf.mxu2 }
 0x1e0   : > { %v1437_v63 = vld [vmem:[%s3413_s11 + $0x8] sm:$0xff] }
 0x1e1   : > { %2270 = vmatmul.msk.f32.gmra.mxu1 %vm746_vm0, %v960_v61  ;;  %v1436_v61 = vld [vmem:[%s3413_s11] sm:$0xff] }
 0x1e2   : > { %1285 = vmatpush.bf16.msra.mxu1 %v2625_v62 }
 0x1e6   : > { %1286 = vmatpush.bf16.msra.mxu1 %v2624_v0  ;;  %v2651_v0 = vld [vmem:[%s3415_s13 + $0x38] sm:$0xff] }
 0x1e7   : > { %v955_v2 = vpop.f32.mrf.mxu2  ;;  %1601 = vmatpush.bf16.msra.mxu3 %v2651_v0  ;;  %v1869_v0 = vld [vmem:[%s3419_s17 + $0x18] sm:$0xff] }
 0x1e8   : > { %985 = vmatpush.msrb.mxu0 %v955_v2  ;;  %v2650_v2 = vld [vmem:[%s3415_s13 + $0x30] sm:$0xff] }
 0x1e9   : > { %2267 = vmatmul.msk.f32.vlgmr.msrb.gmra.mxu0 %vm746_vm0, %v2265_v1  ;;  %v2659_v1 = vld [vmem:[%s3415_s13 + $0x78] sm:$0xff] }
 0x1ea   : > { %1287 = vmatpush.bf16.msra.mxu1 %v2623_v7  ;;  %v2649_v7 = vld [vmem:[%s3415_s13 + $0x28] sm:$0xff] }
 0x1eb   : > { %1602 = vmatpush.bf16.msra.mxu3 %v2650_v2  ;;  %v1709_v2 = vld [vmem:[%s3416_s14 + $0x28] sm:$0xff] }
 0x1ee   : > { %1288 = vmatpush.bf16.msra.mxu1 %v2622_v10  ;;  %v2656_v10 = vld [vmem:[%s3415_s13 + $0x60] sm:$0xff] }
 0x1ef   : > { %v957_v4 = vpop.f32.mrf.mxu2  ;;  %1603 = vmatpush.bf16.msra.mxu3 %v2649_v7  ;;  %v1868_v7 = vld [vmem:[%s3419_s17 + $0x10] sm:$0xff] }
 0x1f1   : > { %2268 = vmatmul.msk.f32.gmra.mxu0 %vm746_vm0, %v2266_v3  ;;  %v2658_v3 = vld [vmem:[%s3415_s13 + $0x70] sm:$0xff] }
 0x1f2   : > { %1289 = vmatpush.bf16.msra.mxu1 %v2621_v13  ;;  %v2449_v13 = vld [vmem:[%s3413_s11 + $0x30] sm:$0xff] }
 0x1f3   : > { %1604 = vmatpush.bf16.msra.mxu3 %v2648_v9  ;;  %v1866_v9 = vld [vmem:[%s3419_s17] sm:$0xff] }
 0x1f6   : > { %1290 = vmatpush.bf16.msra.mxu1 %v2620_v16  ;;  %v2655_v16 = vld [vmem:[%s3415_s13 + $0x58] sm:$0xff] }
 0x1f7   : > { %1605 = vmatpush.bf16.msra.mxu3 %v2647_v15 }
 0x256   : > { %v1016_v17 = vpop.f32.mrf.mxu1 }
 0x25e   : > { %v1019_v19 = vpop.f32.mrf.mxu1 }
 0x266   : > { %v987_v18 = vpop.f32.mrf.mxu0 }
 0x267   : > { %v1017_v20 = vadd.f32 %v1016_v17, %v987_v18  ;;  %v2646_v17 = vld [vmem:[%s3415_s13 + $0x10] sm:$0xff] }
 0x268   : > { %v2654_v18 = vld [vmem:[%s3415_s13 + $0x50] sm:$0xff]  ;;  %1606 = vmatpush.bf16.msra.mxu3 %v2646_v17 }
 0x269   : > { %v1026_v24 = vadd.f32 %v2703_v21, %v1017_v20  ;;  %v2653_v20 = vld [vmem:[%s3415_s13 + $0x48] sm:$0xff] }
 0x26e   : > { %v990_v22 = vpop.f32.mrf.mxu0 }
 0x26f   : > { %v1020_v23 = vadd.f32 %v1019_v19, %v990_v22  ;;  %v2645_v19 = vld [vmem:[%s3415_s13 + $0x8] sm:$0xff]  ;;  %v2652_v22 = vld [vmem:[%s3415_s13 + $0x40] sm:$0xff] }
 0x270   : > { %1607 = vmatpush.bf16.msra.mxu3 %v2645_v19 }
 0x271   : > { %v1027_v25 = vadd.f32 %v2703_v21, %v1020_v23  ;;  %v2644_v21 = vld [vmem:[%s3415_s13] sm:$0xff] }
 0x273   : > { %v1028_v26 = vpack.c.bf16 %v1027_v25, %v1026_v24 }
 0x274   : > { %1608 = vmatpush.bf16.msra.mxu3 %v2644_v21 }
 0x275   : > { %1101 = vmatmul.bf16.vlgmr.msrb.gmra.mxu3 %v1028_v26  ;;  %1197 = vmatmul.bf16.vlgmr.msra.gmra.mxu2 %v1028_v26 }
 0x276   : > { %1291 = vmatmul.bf16.vlgmr.msra.gmra.mxu1 %v1028_v26  ;;  %1426 = vmatpush.bf16.msra.mxu2 %v2643_v40 }
 0x27a   : > { %1427 = vmatpush.bf16.msra.mxu2 %v2642_v41 }
 0x27e   : > { %1428 = vmatpush.bf16.msra.mxu2 %v2641_v42 }
 0x282   : > { %1429 = vmatpush.bf16.msra.mxu2 %v2640_v44 }
 0x2f3   : > { %v1292_v45 = vpop.f32.mrf.mxu1 }
 0x2f8   : > { %v1102_v27 = vpop.f32.mrf.mxu3  ;;  %v1198_v28 = vpop.f32.mrf.mxu2 }
 0x2fb   : > { %v1294_v50 = vpop.f32.mrf.mxu1 }
 0x300   : > { %v1104_v29 = vpop.f32.mrf.mxu3  ;;  %v1200_v31 = vpop.f32.mrf.mxu2 }
 0x301   : > { %1226 = vmatpush.msra.mxu0 %v1104_v29 }
 0x303   : > { %1227 = vmatpush.msra.mxu0 %v1102_v27  ;;  %v2705_v27 = vld [vmem:[%s3414_s12] ss:$0 sm:$0xff] }
 0x304   : > { %2367 = vmatmul.msk.f32.vlgmr.msra.gmra.mxu0 %vm1205_vm2, %v1203_v30 }
 0x305   : > { %1320 = vmatpush.msrb.mxu0 %v1200_v31 }
 0x307   : > { %1321 = vmatpush.msrb.mxu0 %v1198_v28 }
 0x30c   : > { %2368 = vmatmul.msk.f32.gmra.mxu0 %vm1205_vm2, %v1204_v32 }
 0x314   : > { %2403 = vmatmul.msk.f32.vlgmr.msrb.gmra.mxu0 %vm1205_vm2, %v2401_v33 }
 0x31c   : > { %2404 = vmatmul.msk.f32.gmra.mxu0 %vm1205_vm2, %v2402_v34 }
 0x381   : > { %v1229_v39 = vpop.f32.mrf.mxu0 }
 0x382   : > { %v1293_v47 = vadd.f32 %v1292_v45, %v1229_v39 }
 0x389   : > { %v1232_v43 = vpop.f32.mrf.mxu0 }
 0x38a   : > { %v1295_v51 = vadd.f32 %v1294_v50, %v1232_v43  ;;  %v2539_v50 = vld [vmem:[%s3416_s14 + $0x40] sm:$0xff] }
 0x391   : > { %v1323_v46 = vpop.f32.mrf.mxu0 }
 0x392   : > { %v1329_v48 = vadd.f32 %v1323_v46, %v1293_v47 }
 0x394   : > { %v1335_v53 = vadd.f32 %v2704_v49, %v1329_v48 }
 0x396   : > { %v1337_v56 = vmax.f32 %v1335_v53, 0.0  ;;  %v1705_v53 = vld [vmem:[%s3416_s14 + $0x8] sm:$0xff] }
 0x399   : > { %v1326_v52 = vpop.f32.mrf.mxu0 }
 0x39a   : > { %v1330_v54 = vadd.f32 %v1326_v52, %v1295_v51  ;;  %v1704_v51 = vld [vmem:[%s3416_s14] sm:$0xff]  ;;  %v2540_v52 = vld [vmem:[%s3416_s14 + $0x48] sm:$0xff] }
 0x39c   : > { %v1336_v55 = vadd.f32 %v2704_v49, %v1330_v54  ;;  %v2541_v54 = vld [vmem:[%s3416_s14 + $0x50] sm:$0xff] }
 0x39e   : > { %v1338_v57 = vmax.f32 %v1336_v55, 0.0  ;;  %v1706_v55 = vld [vmem:[%s3416_s14 + $0x10] sm:$0xff] }
 0x3a0   : > { %v1339_v58 = vpack.c.bf16 %v1338_v57, %v1337_v56  ;;  %v2542_v56 = vld [vmem:[%s3416_s14 + $0x58] sm:$0xff] }
 0x3a1   : > { %v1707_v57 = vld [vmem:[%s3416_s14 + $0x18] sm:$0xff] }
 0x3a2   : > { %2421 = vmatmul.msk.bf16.vlgmr.msrb.gmra.mxu2 %vm896_vm1, %v1339_v58 }
 0x3a3   : > { %1685 = vmatpush.bf16.msrb.mxu2 %v2659_v1  ;;  %v2544_v1 = vld [vmem:[%s3416_s14 + $0x68] sm:$0xff] }
 0x3a7   : > { %1686 = vmatpush.bf16.msrb.mxu2 %v2658_v3  ;;  %v2545_v3 = vld [vmem:[%s3416_s14 + $0x70] sm:$0xff] }
 0x3ab   : > { %1687 = vmatpush.bf16.msrb.mxu2 %v2657_v8  ;;  %v1867_v8 = vld [vmem:[%s3419_s17 + $0x8] sm:$0xff] }
 0x3af   : > { %1688 = vmatpush.bf16.msrb.mxu2 %v2656_v10  ;;  %v2706_v10 = vld [vmem:[%s3417_s15] ss:$0 sm:$0xff] }
 0x3b2   : > { %2446 = vmatmul.msk.bf16.vlgmr.msra.gmra.mxu2 %vm896_vm1, %v1339_v58  ;;  %v1873_v58 = vld [vmem:[%s3419_s17 + $0x38] sm:$0xff] }
 0x3b3   : > { %1689 = vmatpush.bf16.msrb.mxu2 %v2655_v16  ;;  %1906 = vmatpush.msrb.mxu3 %v1873_v58 }
 0x3b7   : > { %1690 = vmatpush.bf16.msrb.mxu2 %v2654_v18 }
 0x3bb   : > { %1691 = vmatpush.bf16.msrb.mxu2 %v2653_v20 }
 0x3bf   : > { %1692 = vmatpush.bf16.msrb.mxu2 %v2652_v22 }
 0x425   : > { %v1384_v59 = vpop.f32.mrf.mxu2 }
 0x42d   : > { %v1386_v60 = vpop.f32.mrf.mxu2 }
 0x42e   : > { %1512 = vmatpush.msrb.mxu1 %v1386_v60  ;;  %v1871_v60 = vld [vmem:[%s3419_s17 + $0x28] sm:$0xff] }
 0x430   : > { %1513 = vmatpush.msrb.mxu1 %v1384_v59  ;;  %v1872_v59 = vld [vmem:[%s3419_s17 + $0x30] sm:$0xff] }
 0x431   : > { %2455 = vmatmul.msk.f32.vlgmr.msrb.gmra.mxu1 %vm1205_vm2, %v1436_v61  ;;  %1907 = vmatpush.msrb.mxu3 %v1872_v59  ;;  %v1870_v61 = vld [vmem:[%s3419_s17 + $0x20] sm:$0xff] }
 0x433   : > { %1908 = vmatpush.msrb.mxu3 %v1871_v60 }
 0x435   : > { %v1431_v62 = vpop.f32.mrf.mxu2  ;;  %1909 = vmatpush.msrb.mxu3 %v1870_v61 }
 0x437   : > { %1910 = vmatpush.msrb.mxu3 %v1869_v0 }
 0x439   : > { %2456 = vmatmul.msk.f32.gmra.mxu1 %vm1205_vm2, %v1437_v63  ;;  %v1708_v63 = vld [vmem:[%s3416_s14 + $0x20] sm:$0xff]  ;;  %1911 = vmatpush.msrb.mxu3 %v1868_v7 }
 0x43b   : > { %1912 = vmatpush.msrb.mxu3 %v1867_v8 }
 0x43d   : > { %v1433_v4 = vpop.f32.mrf.mxu2  ;;  %1913 = vmatpush.msrb.mxu3 %v1866_v9 }
 0x43e   : > { %1471 = vmatpush.msra.mxu0 %v1433_v4  ;;  %v1710_v4 = vld [vmem:[%s3416_s14 + $0x30] sm:$0xff] }
 0x440   : > { %1472 = vmatpush.msra.mxu0 %v1431_v62  ;;  %v2543_v62 = vld [vmem:[%s3416_s14 + $0x60] sm:$0xff] }
 0x441   : > { %2451 = vmatmul.msk.f32.vlgmr.msra.gmra.mxu0 %vm1205_vm2, %v2447_v5  ;;  %2457 = vmatmul.msk.f32.gmra.mxu1 %vm1205_vm2, %v1438_v6  ;;  %v2546_v5 = vld [vmem:[%s3416_s14 + $0x78] sm:$0xff] }
 0x442   : > { %v1711_v6 = vld [vmem:[%s3416_s14 + $0x38] sm:$0xff] }
 0x449   : > { %2452 = vmatmul.msk.f32.gmra.mxu0 %vm1205_vm2, %v2448_v11  ;;  %2458 = vmatmul.msk.f32.gmra.mxu1 %vm1205_vm2, %v1439_v12 }
 0x451   : > { %2453 = vmatmul.msk.f32.gmra.mxu0 %vm1205_vm2, %v2449_v13 }
 0x459   : > { %2454 = vmatmul.msk.f32.gmra.mxu0 %vm1205_vm2, %v2450_v14 }
 0x4ae   : > { %v1515_v23 = vpop.f32.mrf.mxu1 }
 0x4b6   : > { %v1518_v25 = vpop.f32.mrf.mxu1 }
 0x4be   : > { %v1474_v24 = vpop.f32.mrf.mxu0  ;;  %v1521_v32 = vpop.f32.mrf.mxu1 }
 0x4bf   : > { %v1516_v26 = vadd.f32 %v1515_v23, %v1474_v24 }
 0x4c1   : > { %v1531_v30 = vadd.f32 %v2705_v27, %v1516_v26 }
 0x4c6   : > { %v1477_v28 = vpop.f32.mrf.mxu0  ;;  %v1524_v35 = vpop.f32.mrf.mxu1 }
 0x4c7   : > { %v1519_v29 = vadd.f32 %v1518_v25, %v1477_v28 }
 0x4c9   : > { %v1532_v31 = vadd.f32 %v2705_v27, %v1519_v29 }
 0x4cb   : > { %v1535_v33 = vpack.c.bf16 %v1532_v31, %v1531_v30 }
 0x4cd   : > { %1609 = vmatmul.bf16.vlgmr.msra.gmra.mxu3 %v1535_v33  ;;  %1693 = vmatmul.bf16.vlgmr.msrb.gmra.mxu2 %v1535_v33 }
 0x4ce   : > { %v1480_v34 = vpop.f32.mrf.mxu0 }
 0x4cf   : > { %v1522_v36 = vadd.f32 %v1521_v32, %v1480_v34 }
 0x4d1   : > { %v1533_v39 = vadd.f32 %v2705_v27, %v1522_v36 }
 0x4d6   : > { %v1483_v37 = vpop.f32.mrf.mxu0 }
 0x4d7   : > { %v1525_v38 = vadd.f32 %v1524_v35, %v1483_v37 }
 0x4d9   : > { %v1534_v40 = vadd.f32 %v2705_v27, %v1525_v38 }
 0x4db   : > { %v1536_v41 = vpack.c.bf16 %v1534_v40, %v1533_v39 }
 0x4dd   : > { %1614 = vmatmul.bf16.gmra.mxu3 %v1536_v41  ;;  %1698 = vmatmul.bf16.gmra.mxu2 %v1536_v41 }
 0x550   : > { %v1610_v42 = vpop.f32.mrf.mxu3  ;;  %v1694_v43 = vpop.f32.mrf.mxu2 }
 0x558   : > { %v1612_v44 = vpop.f32.mrf.mxu3  ;;  %v1696_v45 = vpop.f32.mrf.mxu2 }
 0x560   : > { %v1615_v46 = vpop.f32.mrf.mxu3  ;;  %v1699_v47 = vpop.f32.mrf.mxu2 }
 0x568   : > { %v1617_v48 = vpop.f32.mrf.mxu3  ;;  %v1701_v49 = vpop.f32.mrf.mxu2 }
 0x569   : > { %1758 = vmatpush.msrb.mxu0 %v1701_v49  ;;  %1823 = vmatpush.msra.mxu1 %v1617_v48 }
 0x56b   : > { %1759 = vmatpush.msrb.mxu0 %v1699_v47  ;;  %1824 = vmatpush.msra.mxu1 %v1615_v46 }
 0x56d   : > { %1760 = vmatpush.msrb.mxu0 %v1696_v45  ;;  %1825 = vmatpush.msra.mxu1 %v1612_v44 }
 0x56f   : > { %1761 = vmatpush.msrb.mxu0 %v1694_v43  ;;  %1826 = vmatpush.msra.mxu1 %v1610_v42 }
 0x570   : > { %2547 = vmatmul.msk.f32.vlgmr.msrb.gmra.mxu0 %vm1721_vm3, %v2539_v50  ;;  %2555 = vmatmul.msk.f32.vlgmr.msra.gmra.mxu1 %vm1721_vm3, %v1704_v51  ;;  %v1864_v51 = vld [vmem:[%s3418_s16] sm:$0xff] }
 0x578   : > { %2548 = vmatmul.msk.f32.gmra.mxu0 %vm1721_vm3, %v2540_v52  ;;  %2556 = vmatmul.msk.f32.gmra.mxu1 %vm1721_vm3, %v1705_v53  ;;  %v1865_v52 = vld [vmem:[%s3418_s16 + $0x8] sm:$0xff] }
 0x580   : > { %2549 = vmatmul.msk.f32.gmra.mxu0 %vm1721_vm3, %v2541_v54  ;;  %2557 = vmatmul.msk.f32.gmra.mxu1 %vm1721_vm3, %v1706_v55 }
 0x588   : > { %2550 = vmatmul.msk.f32.gmra.mxu0 %vm1721_vm3, %v2542_v56  ;;  %2558 = vmatmul.msk.f32.gmra.mxu1 %vm1721_vm3, %v1707_v57 }
 0x590   : > { %2551 = vmatmul.msk.f32.gmra.mxu0 %vm1721_vm3, %v2543_v62  ;;  %2559 = vmatmul.msk.f32.gmra.mxu1 %vm1721_vm3, %v1708_v63 }
 0x598   : > { %2552 = vmatmul.msk.f32.gmra.mxu0 %vm1721_vm3, %v2544_v1  ;;  %2560 = vmatmul.msk.f32.gmra.mxu1 %vm1721_vm3, %v1709_v2 }
 0x5a0   : > { %2553 = vmatmul.msk.f32.gmra.mxu0 %vm1721_vm3, %v2545_v3  ;;  %2561 = vmatmul.msk.f32.gmra.mxu1 %vm1721_vm3, %v1710_v4 }
 0x5a8   : > { %2554 = vmatmul.msk.f32.gmra.mxu0 %vm1721_vm3, %v2546_v5  ;;  %2562 = vmatmul.msk.f32.gmra.mxu1 %vm1721_vm3, %v1711_v6 }
 0x5ed   : > { %v1763_v11 = vpop.f32.mrf.mxu0  ;;  %v1828_v12 = vpop.f32.mrf.mxu1 }
 0x5ee   : > { %v1829_v13 = vadd.f32 %v1828_v12, %v1763_v11 }
 0x5f0   : > { %v1856_v14 = vadd.f32 %v2706_v10, %v1829_v13 }
 0x5f2   : > { %2563 = vmatmul.msk.f32.vlgmr.msrb.gmra.mxu3 %vm896_vm1, %v1856_v14 }
 0x5f5   : > { %v1766_v15 = vpop.f32.mrf.mxu0  ;;  %v1831_v16 = vpop.f32.mrf.mxu1 }
 0x5f6   : > { %v1832_v17 = vadd.f32 %v1831_v16, %v1766_v15 }
 0x5f8   : > { %v1857_v18 = vadd.f32 %v2706_v10, %v1832_v17 }
 0x5fa   : > { %2564 = vmatmul.msk.f32.gmra.mxu3 %vm896_vm1, %v1857_v18 }
 0x5fd   : > { %v1769_v19 = vpop.f32.mrf.mxu0  ;;  %v1834_v20 = vpop.f32.mrf.mxu1 }
 0x5fe   : > { %v1835_v21 = vadd.f32 %v1834_v20, %v1769_v19 }
 0x600   : > { %v1858_v22 = vadd.f32 %v2706_v10, %v1835_v21 }
 0x602   : > { %2565 = vmatmul.msk.f32.gmra.mxu3 %vm896_vm1, %v1858_v22 }
 0x605   : > { %v1772_v23 = vpop.f32.mrf.mxu0  ;;  %v1837_v24 = vpop.f32.mrf.mxu1 }
 0x606   : > { %v1838_v25 = vadd.f32 %v1837_v24, %v1772_v23 }
 0x608   : > { %v1859_v26 = vadd.f32 %v2706_v10, %v1838_v25 }
 0x60a   : > { %2566 = vmatmul.msk.f32.gmra.mxu3 %vm896_vm1, %v1859_v26 }
 0x60d   : > { %v1775_v27 = vpop.f32.mrf.mxu0  ;;  %v1840_v28 = vpop.f32.mrf.mxu1 }
 0x60e   : > { %v1841_v29 = vadd.f32 %v1840_v28, %v1775_v27 }
 0x610   : > { %v1860_v30 = vadd.f32 %v2706_v10, %v1841_v29 }
 0x612   : > { %2567 = vmatmul.msk.f32.gmra.mxu3 %vm896_vm1, %v1860_v30 }
 0x615   : > { %v1778_v31 = vpop.f32.mrf.mxu0  ;;  %v1843_v32 = vpop.f32.mrf.mxu1 }
 0x616   : > { %v1844_v33 = vadd.f32 %v1843_v32, %v1778_v31 }
 0x618   : > { %v1861_v34 = vadd.f32 %v2706_v10, %v1844_v33 }
 0x61a   : > { %2568 = vmatmul.msk.f32.gmra.mxu3 %vm896_vm1, %v1861_v34 }
 0x61d   : > { %v1781_v35 = vpop.f32.mrf.mxu0  ;;  %v1846_v36 = vpop.f32.mrf.mxu1 }
 0x61e   : > { %v1847_v37 = vadd.f32 %v1846_v36, %v1781_v35 }
 0x620   : > { %v1862_v38 = vadd.f32 %v2706_v10, %v1847_v37 }
 0x622   : > { %2569 = vmatmul.msk.f32.gmra.mxu3 %vm896_vm1, %v1862_v38 }
 0x625   : > { %v1784_v39 = vpop.f32.mrf.mxu0  ;;  %v1849_v40 = vpop.f32.mrf.mxu1 }
 0x626   : > { %v1850_v41 = vadd.f32 %v1849_v40, %v1784_v39 }
 0x628   : > { %v1863_v42 = vadd.f32 %v2706_v10, %v1850_v41 }
 0x62a   : > { %2570 = vmatmul.msk.f32.gmra.mxu3 %vm896_vm1, %v1863_v42 }
 0x675   : > { %v1915_v43 = vpop.f32.mrf.mxu3 }
 0x67d   : > { %v1918_v44 = vpop.f32.mrf.mxu3 }
 0x685   : > { %v1921_v45 = vpop.f32.mrf.mxu3 }
 0x68d   : > { %v1924_v46 = vpop.f32.mrf.mxu3 }
 0x695   : > { %v1927_v47 = vpop.f32.mrf.mxu3 }
 0x69d   : > { %v1930_v48 = vpop.f32.mrf.mxu3 }
 0x6a5   : > { %v1933_v49 = vpop.f32.mrf.mxu3 }
 0x6ad   : > { %v1936_v50 = vpop.f32.mrf.mxu3 }
 0x6ae   : > { %1953 = vmatpush.msra.mxu2 %v1936_v50 }
 0x6b0   : > { %1954 = vmatpush.msra.mxu2 %v1933_v49 }
 0x6b2   : > { %1955 = vmatpush.msra.mxu2 %v1930_v48 }
 0x6b4   : > { %1956 = vmatpush.msra.mxu2 %v1927_v47 }
 0x6b6   : > { %1957 = vmatpush.msra.mxu2 %v1924_v46 }
 0x6b8   : > { %1958 = vmatpush.msra.mxu2 %v1921_v45 }
 0x6ba   : > { %1959 = vmatpush.msra.mxu2 %v1918_v44 }
 0x6bc   : > { %1960 = vmatpush.msra.mxu2 %v1915_v43 }
 0x6bd   : > { %2571 = vmatmul.msk.f32.vlgmr.msra.gmra.mxu2 %vm896_vm1, %v1864_v51 }
 0x6c5   : > { %2572 = vmatmul.msk.f32.gmra.mxu2 %vm896_vm1, %v1865_v52 }
 0x740   : > { %v1962_v53 = vpop.f32.mrf.mxu2 }
 0x741   : > { %v2573_v54 = vmul.f32 -1.442695, %v1962_v53 }
 0x743   : > { %2707 = vpow2.f32 %v2573_v54 }
 0x748   : > { %v1965_v55 = vpop.f32.mrf.mxu2 }
 0x749   : > { %v2708_v56 = vpop.eup %2707  ;;  %v2574_v57 = vmul.f32 -1.442695, %v1965_v55 }
 0x74a   : > { %v1974_v58 = vadd.f32 1.0, %v2708_v56 }
 0x74b   : > { %2709 = vpow2.f32 %v2574_v57 }
 0x74c   : > { %2711 = vrcp.f32 %v1974_v58  ;;  %v1987_v0 = vand.u32 2147483648, %v1974_v58  ;;  %v1985_v2 = vand.u32 2147483647, %v1974_v58  ;;  %vm1981_vm5 = vweird.f32 %v1974_v58 }
 0x74e   : > { %v1988_v5 = vor.u32 1.1754944e-38, %v1987_v0  ;;  %vm1986_vm7 = vcmp.eq.f32.partialorder %v1985_v2, 8.507059e+37 }
 0x751   : > { %v2710_v59 = vpop.eup %2709 }
 0x752   : > { %v2712_v60 = vpop.eup %2711  ;;  %v1975_v61 = vadd.f32 1.0, %v2710_v59 }
 0x753   : > { %v1977_v62 = vmul.f32 %v2712_v60, %v1974_v58  ;;  %vm1982_vm4 = vweird.f32 %v2712_v60 }
 0x754   : > { %2713 = vrcp.f32 %v1975_v61  ;;  %vm1983_vm6 = vmor %vm1981_vm5, %vm1982_vm4  ;;  %v2002_v10 = vand.u32 2147483648, %v1975_v61  ;;  %v2000_v12 = vand.u32 2147483647, %v1975_v61  ;;  %vm1996_vm9 = vweird.f32 %v1975_v61 }
 0x755   : > { %v1978_v63 = vsub.f32 1.0, %v1977_v62 }
 0x756   : > { %v2003_v14 = vor.u32 1.1754944e-38, %v2002_v10  ;;  %vm2001_vm11 = vcmp.eq.f32.partialorder %v2000_v12, 8.507059e+37 }
 0x757   : > { %v1979_v1 = vmul.f32 %v2712_v60, %v1978_v63 }
 0x759   : > { %v1980_v3 = vadd.f32 %v2712_v60, %v1979_v1 }
 0x75a   : > { %v2714_v4 = vpop.eup %2713 }
 0x75b   : > { %v1992_v6 = vmul.f32 %v2714_v4, %v1975_v61  ;;  %v1984_v7 = vsel %vm1983_vm6, %v2712_v60, %v1980_v3  ;;  %vm1997_vm8 = vweird.f32 %v2714_v4 }
 0x75c   : > { %v1989_v8 = vsel %vm1986_vm7, %v1988_v5, %v1984_v7  ;;  %vm1998_vm10 = vmor %vm1996_vm9, %vm1997_vm8 }
 0x75d   : > { %v1993_v9 = vsub.f32 1.0, %v1992_v6  ;;  %2006 = vst.msk [vmem:[%s566_s29] sm:$0xff] %vm1205_vm2, %v1989_v8 }
 0x75f   : > { %v1994_v11 = vmul.f32 %v2714_v4, %v1993_v9 }
 0x761   : > { %v1995_v13 = vadd.f32 %v2714_v4, %v1994_v11 }
 0x763   : > { %v1999_v15 = vsel %vm1998_vm10, %v2714_v4, %v1995_v13 }
 0x764   : > { %v2004_v16 = vsel %vm2001_vm11, %v2003_v14, %v1999_v15 }
 0x765   : > { %2007 = vst.msk [vmem:[%s566_s29 + $0x8] sm:$0xff] %vm1205_vm2, %v2004_v16 }
 0x766   : > { %2742 = shalt.err (!%p2739_p3)
}
 0x767   : > { %s2779_s0 = smov 128   ;;  %s2780_s29 = smov 8  }
 0x768   : > { %2661 = dma.vmem_to_hbm [thread:$0]  (%p2914_p5), %s2022_s1, 256, %s2024_s2, %s2009_s18, %s2779_s0, %s2779_s0, %s2780_s29  }
 0x769 PF: > { %s3462_s4 = sld [smem:[#allocation7_spill]] }
 0x76a   : > { %s3463_s5 = sld [smem:[#allocation5_spill]] }
 0x76f   : > { %p2667_p4 = scmp.ge.s32.totalorder %s3462_s4, 2 }
 0x770   : > { %s2038_s19 = sand.u32 1, %s3463_s5  }
 0x771   : > { %p2664_p7 = pnand %p2667_p4, %p2918_p6  ;;  %s2039_s3 = scalar_lea.sflag [#allocation3], %s2038_s19 }
 0x773   : > { %p2665_p8 = pneg %p2664_p7 }
 0x775   : > { %2760 = dma.done.wait (%p2665_p8), %s2039_s3, 256  }
 0x776   : > { %2762 = vsyncadd (%p2665_p8), %s2039_s3, 4294967040  ;;  %s3465_s30 = sld [smem:[#allocation9_spill]]  ;;  %s3468_s27 = smov %s2769_s28 }
 0x777   : > { %s3466_s25 = sld [smem:[#allocation6_spill]] }
 0x778   : > { %s3467_s29 = sld [smem:[#allocation10_spill]] }
 0x77c   : > { %p28_p9 = scmp.ge.s32.totalorder %s3465_s30, 4  }
 0x77d   : > { %s3469_s28 = smov %s3466_s25 }
 0x77e   :  { %30 = sbr.rel (!%p28_p9) target bundleno = 12 (0xc), region = 139 }
 0x783   :  { %2045 = vsyncpa [#allocation3], 1 }
 0x784   :  { %2047 = vsyncpa [#allocation3 + $0x1], 1 }

</bundles_post_ra>
